<compile_context>
chip_gen: v7x
topology: tpu7x:2x2x1
jax: 0.10.0
libtpu: 0.0.40
codegen_flags: <defaults>
</compile_context>

<pallas_src>
import numpy as np
import jax
import jax.numpy as jnp
from jax import lax
from jax.experimental import pallas as pl
from jax.experimental.pallas import tpu as pltpu


# ----------------------------------------------------------------------------
# Model geometry (ECG_Model: conv k=(2,3), pad=1, pool (2,3), fc1 in = 448)
# Input (N, 1, 6, 64): conv1 -> (7,64) -> pool (3,21) -> conv2 -> (4,21)
#                      -> pool (2,7); 32*2*7 = 448.
# ----------------------------------------------------------------------------
H_IN, W_IN = 6, 64
C1, C2 = 16, 32
H1, W1 = 3, 21            # stage-1 pooled spatial size
HQ2, WQ2 = 2, 7           # stage-2 pooled spatial size
S2PIX = HQ2 * WQ2         # 14 real pooled pixels per sample in stage 2
N_SHIFTS = 15             # deduped conv2 shifts: dh in {-1,0,1} x dw in {-1..3}
TILE_B = 1                # samples per grid step (selection matrix is built
                          # for TILE_B samples only -> batch-size independent)


def _round_up(x, m):
    return ((x + m - 1) // m) * m


# ----------------------------------------------------------------------------
# Fused kernel (one grid step = TILE_B samples)
# ----------------------------------------------------------------------------
def make_ecg_kernel(tile_b):
    g1b = _round_up(tile_b * H1 * W1, 8)   # stage-1 rows per pool group (64 @ tb=1)
    r2b = _round_up(tile_b * S2PIX, 8)     # stage-2 rows per shift / pool group (16)

    def kernel(p1_ref, w1_ref, b1_ref, s1_ref, t1_ref,
               s2v_ref, w2_ref, b2_ref, s2_ref, t2_ref,
               f1w_ref, f1b_ref, f2w_ref, f2b_ref, o_ref):
        # ---- stage 1: ONE bf16 im2col GEMM over the 6 pool-window offsets ----
        y = jnp.dot(p1_ref[0], w1_ref[...], preferred_element_type=jnp.float32)
        y = jnp.maximum(y + b1_ref[...], 0.0) * s1_ref[...] + t1_ref[...]
        y1 = y[0:g1b]
        for g in range(1, 6):                    # max-pool over 6 aligned row blocks
            y1 = jnp.maximum(y1, y[g * g1b:(g + 1) * g1b])          # (g1b, 16)

        # ---- stage 2 im2col: ONE deduped selection GEMM (15 unique shifts) ----
        rsel = jnp.dot(s2v_ref[...], y1.astype(jnp.bfloat16),
                       preferred_element_type=jnp.float32)          # (15*r2b, 16)

        # Gather the 6 conv2 taps along the contraction dim -> single K=96 GEMM.
        # For tap (a,b) the 6 pool groups are two runs of 3 consecutive,
        # r2b-aligned shift blocks (rows end up ordered (group, pixel, sample)).
        pieces = []
        for a in range(2):
            for b in range(3):
                lo0 = (a * 5 + b) * r2b
                lo1 = ((a + 1) * 5 + b) * r2b
                pieces.append(jnp.concatenate(
                    [rsel[lo0:lo0 + 3 * r2b], rsel[lo1:lo1 + 3 * r2b]], axis=0))
        a2 = jnp.concatenate(pieces, axis=1).astype(jnp.bfloat16)   # (6*r2b, 96)

        z = jnp.dot(a2, w2_ref[...], preferred_element_type=jnp.float32)  # (6*r2b, 32)
        z = jnp.maximum(z + b2_ref[...], 0.0) * s2_ref[...] + t2_ref[...]
        y2 = z[0:r2b]
        for g in range(1, 6):                    # max-pool over 6 aligned row blocks
            y2 = jnp.maximum(y2, z[g * r2b:(g + 1) * r2b])          # (r2b, 32)

        # ---- flatten: pixel-major rows -> one lane-axis concat (no store loop);
        #      NCHW ordering is absorbed into permuted fc1 rows (host side).
        #      Padded pixel rows (>= 14*tile_b) are simply never read.
        flat = jnp.concatenate(
            [y2[s * tile_b:(s + 1) * tile_b] for s in range(S2PIX)],
            axis=1).astype(jnp.bfloat16)                            # (tile_b, 448)

        # ---- FC head (dropout = identity in inference) ------------------------
        h = jnp.maximum(
            jnp.dot(flat, f1w_ref[...], preferred_element_type=jnp.float32)
            + f1b_ref[...], 0.0)
        o = jnp.dot(h.astype(jnp.bfloat16), f2w_ref[...],
                    preferred_element_type=jnp.float32) + f2b_ref[...]
        o_ref[0] = o.astype(o_ref.dtype)

    return kernel


# ----------------------------------------------------------------------------
# Host-side constants (built once, outside jit)
# ----------------------------------------------------------------------------
def _build_s2v(tile_b):
    """0/1 selection doing stage-2 im2col for the 15 unique (dh, dw) shifts.

    Rows: (shift d, pixel s, sample-in-tile bb), padded to r2b per shift block.
    Cols: (sample-in-tile bb, h1*21 + w1), padded to g1b.  Pad rows/cols stay
    all-zero so stage-1/2 padding garbage is never read.  Size is O(TILE_B^2)
    and independent of the real batch (the batch runs on the grid axis).
    """
    g1b = _round_up(tile_b * H1 * W1, 8)
    r2b = _round_up(tile_b * S2PIX, 8)
    s = np.zeros((N_SHIFTS * r2b, g1b), np.float32)
    for dh in range(-1, 2):
        for dw in range(-1, 4):
            d = (dh + 1) * 5 + (dw + 1)
            for i2 in range(HQ2):
                for j2 in range(WQ2):
                    h1 = 2 * i2 + dh
                    w1 = 3 * j2 + dw
                    if 0 <= h1 < H1 and 0 <= w1 < W1:
                        for bb in range(tile_b):
                            row = d * r2b + (i2 * WQ2 + j2) * tile_b + bb
                            col = bb * H1 * W1 + h1 * W1 + w1
                            s[row, col] = 1.0
    return s


def prepare_kernel_params(params, tile_b):
    """One-time reshuffle of weights into kernel layout (runs eagerly)."""
    # Kernel flat lane index k = s*32 + c must read PyTorch flatten row c*14 + s.
    perm = np.array([c * S2PIX + s for s in range(S2PIX) for c in range(C2)],
                    np.int32)
    return dict(
        w1=params["conv1_w"].astype(jnp.bfloat16),          # (6, 16) rows=(kh,kw)
        b1=params["conv1_b"], s1=params["bn1_scale"], t1=params["bn1_shift"],
        s2v=jnp.asarray(_build_s2v(tile_b), jnp.bfloat16),   # (15*r2b, g1b), exact 0/1
        w2=params["conv2_w"].astype(jnp.bfloat16),           # (96, 32) rows=(kh,kw,cin)
        b2=params["conv2_b"], s2=params["bn2_scale"], t2=params["bn2_shift"],
        fc1w=params["fc1_w"][perm, :].astype(jnp.bfloat16),  # flatten order absorbed
        fc1b=params["fc1_b"],
        fc2w=params["fc2_w"].astype(jnp.bfloat16),
        fc2b=params["fc2_b"],
    )


# ----------------------------------------------------------------------------
# Stage-1 im2col (input-side layout plumbing only, fused by XLA), batch-blocked
# ----------------------------------------------------------------------------
def _build_patches1(x_nchw, tile_b):
    n = x_nchw.shape[0]
    nb = n // tile_b
    g1b = _round_up(tile_b * H1 * W1, 8)
    xs = x_nchw[:, 0].astype(jnp.float32)                   # (n, 6, 64)
    xp = jnp.pad(xs, ((0, 0), (1, 1), (1, 1)))              # (n, 8, 66)  padding=1
    taps = [xp[:, a:a + 7, b:b + 64] for a in range(2) for b in range(3)]
    pat = jnp.stack(taps, axis=-1)                          # (n, 7, 64, 6)
    pat = pat[:, :2 * H1, :3 * W1, :]                       # floor-pool crop (6, 63)
    pat = pat.reshape(nb, tile_b, H1, 2, W1, 3, 6)          # (nb,bb,i1,p,j1,q,k)
    pat = jnp.transpose(pat, (0, 3, 5, 1, 2, 4, 6))         # (nb,p,q,bb,i1,j1,k)
    pat = pat.reshape(nb, 6, tile_b * H1 * W1, 6)
    pat = jnp.pad(pat, ((0, 0), (0, 0), (0, g1b - tile_b * H1 * W1), (0, 0)))
    return pat.reshape(nb, 6 * g1b, 6).astype(jnp.bfloat16)


def ecg_forward_fused(kp, x_nchw, tile_b=TILE_B):
    n = x_nchw.shape[0]
    assert n % tile_b == 0, "batch must be divisible by the batch tile"
    nb = n // tile_b
    g1b = _round_up(tile_b * H1 * W1, 8)

    patches = _build_patches1(x_nchw, tile_b)               # (nb, 6*g1b, 6) bf16
    kernel = make_ecg_kernel(tile_b)

    def const_spec(arr):
        return pl.BlockSpec(arr.shape, lambda j, _nd=arr.ndim: (0,) * _nd)

    args = (patches, kp["w1"], kp["b1"], kp["s1"], kp["t1"],
            kp["s2v"], kp["w2"], kp["b2"], kp["s2"], kp["t2"],
            kp["fc1w"], kp["fc1b"], kp["fc2w"], kp["fc2b"])

    in_specs = [pl.BlockSpec((1, 6 * g1b, 6), lambda j: (j, 0, 0))]
    in_specs += [const_spec(a) for a in args[1:]]

    out = pl.pallas_call(
        kernel,
        out_shape=jax.ShapeDtypeStruct((nb, tile_b, 4), jnp.float32),
        grid_spec=pltpu.PrefetchScalarGridSpec(
            num_scalar_prefetch=0,
            grid=(nb,),
            in_specs=in_specs,
            out_specs=pl.BlockSpec((1, tile_b, 4), lambda j: (j, 0, 0)),
        ),
        compiler_params=pltpu.CompilerParams(
            dimension_semantics=("parallel",)),
    )(*args)
    return out.reshape(n, 4)


# ----------------------------------------------------------------------------
# Deterministic parameter init (shapes from ECG_Model.__init__)
# ----------------------------------------------------------------------------
def init_params(key):
    k = jax.random.split(key, 10)

    def nrm(kk, shape, s=0.1):
        return jax.random.normal(kk, shape, jnp.float32) * s

    def bn_affine(kk, c):
        kg, kb, km, kv = jax.random.split(kk, 4)
        gamma = 1.0 + 0.1 * jax.random.normal(kg, (1, c), jnp.float32)
        beta = 0.1 * jax.random.normal(kb, (1, c), jnp.float32)
        mean = 0.1 * jax.random.normal(km, (1, c), jnp.float32)
        var = jnp.abs(jax.random.normal(kv, (1, c), jnp.float32)) + 0.5
        scale = gamma / jnp.sqrt(var + 1e-5)
        shift = beta - mean * scale
        return scale, shift

    bn1_scale, bn1_shift = bn_affine(k[4], C1)
    bn2_scale, bn2_shift = bn_affine(k[5], C2)
    return dict(
        conv1_w=nrm(k[0], (2, 3, 1, C1)).reshape(6, C1),     # HWIO flattened
        conv1_b=nrm(k[1], (1, C1)),
        conv2_w=nrm(k[2], (2, 3, C1, C2)).reshape(96, C2),
        conv2_b=nrm(k[3], (1, C2)),
        bn1_scale=bn1_scale, bn1_shift=bn1_shift,
        bn2_scale=bn2_scale, bn2_shift=bn2_shift,
        fc1_w=nrm(k[6], (448, 80), 0.05), fc1_b=nrm(k[7], (1, 80)),
        fc2_w=nrm(k[8], (80, 4), 0.05), fc2_b=nrm(k[9], (1, 4)),
    )


# ----------------------------------------------------------------------------
# Pure-JAX reference (same inference semantics, f32)
# ----------------------------------------------------------------------------
def ecg_forward_ref(params, x_nchw):
    x = jnp.transpose(x_nchw, (0, 2, 3, 1)).astype(jnp.float32)

    def stage(x, w_flat, b, scale, shift, kh, kw, cin, cout):
        w = w_flat.reshape(kh, kw, cin, cout)
        y = lax.conv_general_dilated(x, w, window_strides=(1, 1),
                                     padding=((1, 1), (1, 1)),
                                     dimension_numbers=("NHWC", "HWIO", "NHWC"))
        y = jnp.maximum(y + b.reshape(1, 1, 1, -1), 0.0)
        y = y * scale.reshape(1, 1, 1, -1) + shift.reshape(1, 1, 1, -1)
        return lax.reduce_window(y, -jnp.inf, lax.max,
                                 (1, 2, 3, 1), (1, 2, 3, 1), "VALID")

    y = stage(x, params["conv1_w"], params["conv1_b"],
              params["bn1_scale"], params["bn1_shift"], 2, 3, 1, C1)
    y = stage(y, params["conv2_w"], params["conv2_b"],
              params["bn2_scale"], params["bn2_shift"], 2, 3, C1, C2)
    n = y.shape[0]
    flat = jnp.transpose(y, (0, 3, 1, 2)).reshape(n, -1)
    h = jnp.maximum(flat @ params["fc1_w"] + params["fc1_b"], 0.0)
    return h @ params["fc2_w"] + params["fc2_b"]


if __name__ == "__main__":
    key = jax.random.PRNGKey(0)
    pkey, xkey = jax.random.split(key)
    params = init_params(pkey)

    # Input NCHW (N=2, C=1, H=6, W=64): two conv/pool stages -> 32*2*7 = 448 = fc1 in.
    x = jax.random.normal(xkey, (2, 1, H_IN, W_IN), jnp.float32)

    kparams = prepare_kernel_params(params, TILE_B)          # one-time host prep
    fwd = jax.jit(lambda kp, xx: ecg_forward_fused(kp, xx, TILE_B))
    out = jax.block_until_ready(fwd(kparams, x))
    assert out.shape == (2, 4)

    ref = jax.block_until_ready(ecg_forward_ref(params, x))
    np.testing.assert_allclose(np.asarray(out), np.asarray(ref),
                               rtol=2e-2, atol=2e-2)

    print("KERNEL_OK")
</pallas_src>

<mosaic_0001>
module attributes {stable_mosaic.version = 11 : i64} {
  func.func @kernel(%arg0: i32, %arg1: memref<1x384x6xbf16, #tpu.memory_space<vmem>>, %arg2: memref<6x16xbf16, #tpu.memory_space<vmem>>, %arg3: memref<1x16xf32, #tpu.memory_space<vmem>>, %arg4: memref<1x16xf32, #tpu.memory_space<vmem>>, %arg5: memref<1x16xf32, #tpu.memory_space<vmem>>, %arg6: memref<240x64xbf16, #tpu.memory_space<vmem>>, %arg7: memref<96x32xbf16, #tpu.memory_space<vmem>>, %arg8: memref<1x32xf32, #tpu.memory_space<vmem>>, %arg9: memref<1x32xf32, #tpu.memory_space<vmem>>, %arg10: memref<1x32xf32, #tpu.memory_space<vmem>>, %arg11: memref<448x80xbf16, #tpu.memory_space<vmem>>, %arg12: memref<1x80xf32, #tpu.memory_space<vmem>>, %arg13: memref<80x4xbf16, #tpu.memory_space<vmem>>, %arg14: memref<1x4xf32, #tpu.memory_space<vmem>>, %arg15: memref<1x1x4xf32, #tpu.memory_space<vmem>>) attributes {dimension_semantics = [#tpu.dimension_semantics<parallel>], iteration_bounds = array<i64: 2>, scalar_prefetch = 0 : i64, scratch_operands = 0 : i64, tpu.core_type = #tpu.core_type<tc>, window_params = [{transform_indices = @transform_0, window_bounds = array<i64: 1, 384, 6>}, {pipeline_mode = #tpu.pipeline_mode<synchronous>, transform_indices = @transform_1, window_bounds = array<i64: 6, 16>}, {pipeline_mode = #tpu.pipeline_mode<synchronous>, transform_indices = @transform_2, window_bounds = array<i64: 1, 16>}, {pipeline_mode = #tpu.pipeline_mode<synchronous>, transform_indices = @transform_3, window_bounds = array<i64: 1, 16>}, {pipeline_mode = #tpu.pipeline_mode<synchronous>, transform_indices = @transform_4, window_bounds = array<i64: 1, 16>}, {pipeline_mode = #tpu.pipeline_mode<synchronous>, transform_indices = @transform_5, window_bounds = array<i64: 240, 64>}, {pipeline_mode = #tpu.pipeline_mode<synchronous>, transform_indices = @transform_6, window_bounds = array<i64: 96, 32>}, {pipeline_mode = #tpu.pipeline_mode<synchronous>, transform_indices = @transform_7, window_bounds = array<i64: 1, 32>}, {pipeline_mode = #tpu.pipeline_mode<synchronous>, transform_indices = @transform_8, window_bounds = array<i64: 1, 32>}, {pipeline_mode = #tpu.pipeline_mode<synchronous>, transform_indices = @transform_9, window_bounds = array<i64: 1, 32>}, {pipeline_mode = #tpu.pipeline_mode<synchronous>, transform_indices = @transform_10, window_bounds = array<i64: 448, 80>}, {pipeline_mode = #tpu.pipeline_mode<synchronous>, transform_indices = @transform_11, window_bounds = array<i64: 1, 80>}, {pipeline_mode = #tpu.pipeline_mode<synchronous>, transform_indices = @transform_12, window_bounds = array<i64: 80, 4>}, {pipeline_mode = #tpu.pipeline_mode<synchronous>, transform_indices = @transform_13, window_bounds = array<i64: 1, 4>}, {transform_indices = @transform_14, window_bounds = array<i64: 1, 1, 4>}]} {
    %c0 = arith.constant 0 : index
    %c0_0 = arith.constant 0 : index
    %c0_1 = arith.constant 0 : index
    %0 = vector.load %arg1[%c0, %c0_0, %c0_1] : memref<1x384x6xbf16, #tpu.memory_space<vmem>>, vector<1x384x6xbf16>
    %1 = vector.shape_cast %0 : vector<1x384x6xbf16> to vector<384x6xbf16>
    %c0_2 = arith.constant 0 : index
    %c0_3 = arith.constant 0 : index
    %2 = vector.load %arg2[%c0_2, %c0_3] : memref<6x16xbf16, #tpu.memory_space<vmem>>, vector<6x16xbf16>
    %cst = arith.constant dense<0.000000e+00> : vector<384x16xf32>
    %3 = tpu.matmul %1, %2, %cst {dimension_numbers = #tpu.dot_dimension_numbers<[1], [0], [0], [1], [0, 0, 1, 1], [], []>} : vector<384x6xbf16>, vector<6x16xbf16>, vector<384x16xf32> -> vector<384x16xf32>
    %c0_4 = arith.constant 0 : index
    %c0_5 = arith.constant 0 : index
    %4 = vector.load %arg3[%c0_4, %c0_5] : memref<1x16xf32, #tpu.memory_space<vmem>>, vector<1x16xf32>
    %5 = vector.broadcast %4 : vector<1x16xf32> to vector<384x16xf32>
    %6 = arith.addf %3, %5 : vector<384x16xf32>
    %cst_6 = arith.constant 0.000000e+00 : f32
    %7 = vector.broadcast %cst_6 : f32 to vector<384x16xf32>
    %8 = arith.maximumf %6, %7 : vector<384x16xf32>
    %c0_7 = arith.constant 0 : index
    %c0_8 = arith.constant 0 : index
    %9 = vector.load %arg4[%c0_7, %c0_8] : memref<1x16xf32, #tpu.memory_space<vmem>>, vector<1x16xf32>
    %10 = vector.broadcast %9 : vector<1x16xf32> to vector<384x16xf32>
    %11 = arith.mulf %8, %10 : vector<384x16xf32>
    %c0_9 = arith.constant 0 : index
    %c0_10 = arith.constant 0 : index
    %12 = vector.load %arg5[%c0_9, %c0_10] : memref<1x16xf32, #tpu.memory_space<vmem>>, vector<1x16xf32>
    %13 = vector.broadcast %12 : vector<1x16xf32> to vector<384x16xf32>
    %14 = arith.addf %11, %13 : vector<384x16xf32>
    %15 = vector.extract_strided_slice %14 {offsets = [0, 0], sizes = [64, 16], strides = [1, 1]} : vector<384x16xf32> to vector<64x16xf32>
    %16 = vector.extract_strided_slice %14 {offsets = [64, 0], sizes = [64, 16], strides = [1, 1]} : vector<384x16xf32> to vector<64x16xf32>
    %17 = arith.maximumf %15, %16 : vector<64x16xf32>
    %18 = vector.extract_strided_slice %14 {offsets = [128, 0], sizes = [64, 16], strides = [1, 1]} : vector<384x16xf32> to vector<64x16xf32>
    %19 = arith.maximumf %17, %18 : vector<64x16xf32>
    %20 = vector.extract_strided_slice %14 {offsets = [192, 0], sizes = [64, 16], strides = [1, 1]} : vector<384x16xf32> to vector<64x16xf32>
    %21 = arith.maximumf %19, %20 : vector<64x16xf32>
    %22 = vector.extract_strided_slice %14 {offsets = [256, 0], sizes = [64, 16], strides = [1, 1]} : vector<384x16xf32> to vector<64x16xf32>
    %23 = arith.maximumf %21, %22 : vector<64x16xf32>
    %24 = vector.extract_strided_slice %14 {offsets = [320, 0], sizes = [64, 16], strides = [1, 1]} : vector<384x16xf32> to vector<64x16xf32>
    %25 = arith.maximumf %23, %24 : vector<64x16xf32>
    %c0_11 = arith.constant 0 : index
    %c0_12 = arith.constant 0 : index
    %26 = vector.load %arg6[%c0_11, %c0_12] : memref<240x64xbf16, #tpu.memory_space<vmem>>, vector<240x64xbf16>
    %27 = arith.truncf %25 : vector<64x16xf32> to vector<64x16xbf16>
    %cst_13 = arith.constant dense<0.000000e+00> : vector<240x16xf32>
    %28 = tpu.matmul %26, %27, %cst_13 {dimension_numbers = #tpu.dot_dimension_numbers<[1], [0], [0], [1], [0, 0, 1, 1], [], []>} : vector<240x64xbf16>, vector<64x16xbf16>, vector<240x16xf32> -> vector<240x16xf32>
    %29 = vector.extract_strided_slice %28 {offsets = [0, 0], sizes = [48, 16], strides = [1, 1]} : vector<240x16xf32> to vector<48x16xf32>
    %30 = vector.extract_strided_slice %28 {offsets = [80, 0], sizes = [48, 16], strides = [1, 1]} : vector<240x16xf32> to vector<48x16xf32>
    %31 = tpu.concatenate %29, %30 in 0 : vector<48x16xf32>, vector<48x16xf32> -> vector<96x16xf32>
    %32 = vector.extract_strided_slice %28 {offsets = [16, 0], sizes = [48, 16], strides = [1, 1]} : vector<240x16xf32> to vector<48x16xf32>
    %33 = vector.extract_strided_slice %28 {offsets = [96, 0], sizes = [48, 16], strides = [1, 1]} : vector<240x16xf32> to vector<48x16xf32>
    %34 = tpu.concatenate %32, %33 in 0 : vector<48x16xf32>, vector<48x16xf32> -> vector<96x16xf32>
    %35 = vector.extract_strided_slice %28 {offsets = [32, 0], sizes = [48, 16], strides = [1, 1]} : vector<240x16xf32> to vector<48x16xf32>
    %36 = vector.extract_strided_slice %28 {offsets = [112, 0], sizes = [48, 16], strides = [1, 1]} : vector<240x16xf32> to vector<48x16xf32>
    %37 = tpu.concatenate %35, %36 in 0 : vector<48x16xf32>, vector<48x16xf32> -> vector<96x16xf32>
    %38 = vector.extract_strided_slice %28 {offsets = [80, 0], sizes = [48, 16], strides = [1, 1]} : vector<240x16xf32> to vector<48x16xf32>
    %39 = vector.extract_strided_slice %28 {offsets = [160, 0], sizes = [48, 16], strides = [1, 1]} : vector<240x16xf32> to vector<48x16xf32>
    %40 = tpu.concatenate %38, %39 in 0 : vector<48x16xf32>, vector<48x16xf32> -> vector<96x16xf32>
    %41 = vector.extract_strided_slice %28 {offsets = [96, 0], sizes = [48, 16], strides = [1, 1]} : vector<240x16xf32> to vector<48x16xf32>
    %42 = vector.extract_strided_slice %28 {offsets = [176, 0], sizes = [48, 16], strides = [1, 1]} : vector<240x16xf32> to vector<48x16xf32>
    %43 = tpu.concatenate %41, %42 in 0 : vector<48x16xf32>, vector<48x16xf32> -> vector<96x16xf32>
    %44 = vector.extract_strided_slice %28 {offsets = [112, 0], sizes = [48, 16], strides = [1, 1]} : vector<240x16xf32> to vector<48x16xf32>
    %45 = vector.extract_strided_slice %28 {offsets = [192, 0], sizes = [48, 16], strides = [1, 1]} : vector<240x16xf32> to vector<48x16xf32>
    %46 = tpu.concatenate %44, %45 in 0 : vector<48x16xf32>, vector<48x16xf32> -> vector<96x16xf32>
    %47 = tpu.concatenate %31, %34, %37, %40, %43, %46 in 1 : vector<96x16xf32>, vector<96x16xf32>, vector<96x16xf32>, vector<96x16xf32>, vector<96x16xf32>, vector<96x16xf32> -> vector<96x96xf32>
    %48 = arith.truncf %47 : vector<96x96xf32> to vector<96x96xbf16>
    %c0_14 = arith.constant 0 : index
    %c0_15 = arith.constant 0 : index
    %49 = vector.load %arg7[%c0_14, %c0_15] : memref<96x32xbf16, #tpu.memory_space<vmem>>, vector<96x32xbf16>
    %cst_16 = arith.constant dense<0.000000e+00> : vector<96x32xf32>
    %50 = tpu.matmul %48, %49, %cst_16 {dimension_numbers = #tpu.dot_dimension_numbers<[1], [0], [0], [1], [0, 0, 1, 1], [], []>} : vector<96x96xbf16>, vector<96x32xbf16>, vector<96x32xf32> -> vector<96x32xf32>
    %c0_17 = arith.constant 0 : index
    %c0_18 = arith.constant 0 : index
    %51 = vector.load %arg8[%c0_17, %c0_18] : memref<1x32xf32, #tpu.memory_space<vmem>>, vector<1x32xf32>
    %52 = vector.broadcast %51 : vector<1x32xf32> to vector<96x32xf32>
    %53 = arith.addf %50, %52 : vector<96x32xf32>
    %cst_19 = arith.constant 0.000000e+00 : f32
    %54 = vector.broadcast %cst_19 : f32 to vector<96x32xf32>
    %55 = arith.maximumf %53, %54 : vector<96x32xf32>
    %c0_20 = arith.constant 0 : index
    %c0_21 = arith.constant 0 : index
    %56 = vector.load %arg9[%c0_20, %c0_21] : memref<1x32xf32, #tpu.memory_space<vmem>>, vector<1x32xf32>
    %57 = vector.broadcast %56 : vector<1x32xf32> to vector<96x32xf32>
    %58 = arith.mulf %55, %57 : vector<96x32xf32>
    %c0_22 = arith.constant 0 : index
    %c0_23 = arith.constant 0 : index
    %59 = vector.load %arg10[%c0_22, %c0_23] : memref<1x32xf32, #tpu.memory_space<vmem>>, vector<1x32xf32>
    %60 = vector.broadcast %59 : vector<1x32xf32> to vector<96x32xf32>
    %61 = arith.addf %58, %60 : vector<96x32xf32>
    %62 = vector.extract_strided_slice %61 {offsets = [0, 0], sizes = [16, 32], strides = [1, 1]} : vector<96x32xf32> to vector<16x32xf32>
    %63 = vector.extract_strided_slice %61 {offsets = [16, 0], sizes = [16, 32], strides = [1, 1]} : vector<96x32xf32> to vector<16x32xf32>
    %64 = arith.maximumf %62, %63 : vector<16x32xf32>
    %65 = vector.extract_strided_slice %61 {offsets = [32, 0], sizes = [16, 32], strides = [1, 1]} : vector<96x32xf32> to vector<16x32xf32>
    %66 = arith.maximumf %64, %65 : vector<16x32xf32>
    %67 = vector.extract_strided_slice %61 {offsets = [48, 0], sizes = [16, 32], strides = [1, 1]} : vector<96x32xf32> to vector<16x32xf32>
    %68 = arith.maximumf %66, %67 : vector<16x32xf32>
    %69 = vector.extract_strided_slice %61 {offsets = [64, 0], sizes = [16, 32], strides = [1, 1]} : vector<96x32xf32> to vector<16x32xf32>
    %70 = arith.maximumf %68, %69 : vector<16x32xf32>
    %71 = vector.extract_strided_slice %61 {offsets = [80, 0], sizes = [16, 32], strides = [1, 1]} : vector<96x32xf32> to vector<16x32xf32>
    %72 = arith.maximumf %70, %71 : vector<16x32xf32>
    %73 = vector.extract_strided_slice %72 {offsets = [0, 0], sizes = [1, 32], strides = [1, 1]} : vector<16x32xf32> to vector<1x32xf32>
    %74 = vector.extract_strided_slice %72 {offsets = [1, 0], sizes = [1, 32], strides = [1, 1]} : vector<16x32xf32> to vector<1x32xf32>
    %75 = vector.extract_strided_slice %72 {offsets = [2, 0], sizes = [1, 32], strides = [1, 1]} : vector<16x32xf32> to vector<1x32xf32>
    %76 = vector.extract_strided_slice %72 {offsets = [3, 0], sizes = [1, 32], strides = [1, 1]} : vector<16x32xf32> to vector<1x32xf32>
    %77 = vector.extract_strided_slice %72 {offsets = [4, 0], sizes = [1, 32], strides = [1, 1]} : vector<16x32xf32> to vector<1x32xf32>
    %78 = vector.extract_strided_slice %72 {offsets = [5, 0], sizes = [1, 32], strides = [1, 1]} : vector<16x32xf32> to vector<1x32xf32>
    %79 = vector.extract_strided_slice %72 {offsets = [6, 0], sizes = [1, 32], strides = [1, 1]} : vector<16x32xf32> to vector<1x32xf32>
    %80 = vector.extract_strided_slice %72 {offsets = [7, 0], sizes = [1, 32], strides = [1, 1]} : vector<16x32xf32> to vector<1x32xf32>
    %81 = vector.extract_strided_slice %72 {offsets = [8, 0], sizes = [1, 32], strides = [1, 1]} : vector<16x32xf32> to vector<1x32xf32>
    %82 = vector.extract_strided_slice %72 {offsets = [9, 0], sizes = [1, 32], strides = [1, 1]} : vector<16x32xf32> to vector<1x32xf32>
    %83 = vector.extract_strided_slice %72 {offsets = [10, 0], sizes = [1, 32], strides = [1, 1]} : vector<16x32xf32> to vector<1x32xf32>
    %84 = vector.extract_strided_slice %72 {offsets = [11, 0], sizes = [1, 32], strides = [1, 1]} : vector<16x32xf32> to vector<1x32xf32>
    %85 = vector.extract_strided_slice %72 {offsets = [12, 0], sizes = [1, 32], strides = [1, 1]} : vector<16x32xf32> to vector<1x32xf32>
    %86 = vector.extract_strided_slice %72 {offsets = [13, 0], sizes = [1, 32], strides = [1, 1]} : vector<16x32xf32> to vector<1x32xf32>
    %87 = tpu.concatenate %73, %74, %75, %76, %77, %78, %79, %80, %81, %82, %83, %84, %85, %86 in 1 : vector<1x32xf32>, vector<1x32xf32>, vector<1x32xf32>, vector<1x32xf32>, vector<1x32xf32>, vector<1x32xf32>, vector<1x32xf32>, vector<1x32xf32>, vector<1x32xf32>, vector<1x32xf32>, vector<1x32xf32>, vector<1x32xf32>, vector<1x32xf32>, vector<1x32xf32> -> vector<1x448xf32>
    %88 = arith.truncf %87 : vector<1x448xf32> to vector<1x448xbf16>
    %c0_24 = arith.constant 0 : index
    %c0_25 = arith.constant 0 : index
    %89 = vector.load %arg11[%c0_24, %c0_25] : memref<448x80xbf16, #tpu.memory_space<vmem>>, vector<448x80xbf16>
    %cst_26 = arith.constant dense<0.000000e+00> : vector<1x80xf32>
    %90 = tpu.matmul %88, %89, %cst_26 {dimension_numbers = #tpu.dot_dimension_numbers<[1], [0], [0], [1], [0, 0, 1, 1], [], []>} : vector<1x448xbf16>, vector<448x80xbf16>, vector<1x80xf32> -> vector<1x80xf32>
    %c0_27 = arith.constant 0 : index
    %c0_28 = arith.constant 0 : index
    %91 = vector.load %arg12[%c0_27, %c0_28] : memref<1x80xf32, #tpu.memory_space<vmem>>, vector<1x80xf32>
    %92 = arith.addf %90, %91 : vector<1x80xf32>
    %cst_29 = arith.constant 0.000000e+00 : f32
    %93 = vector.broadcast %cst_29 : f32 to vector<1x80xf32>
    %94 = arith.maximumf %92, %93 : vector<1x80xf32>
    %95 = arith.truncf %94 : vector<1x80xf32> to vector<1x80xbf16>
    %c0_30 = arith.constant 0 : index
    %c0_31 = arith.constant 0 : index
    %96 = vector.load %arg13[%c0_30, %c0_31] : memref<80x4xbf16, #tpu.memory_space<vmem>>, vector<80x4xbf16>
    %cst_32 = arith.constant dense<0.000000e+00> : vector<1x4xf32>
    %97 = tpu.matmul %95, %96, %cst_32 {dimension_numbers = #tpu.dot_dimension_numbers<[1], [0], [0], [1], [0, 0, 1, 1], [], []>} : vector<1x80xbf16>, vector<80x4xbf16>, vector<1x4xf32> -> vector<1x4xf32>
    %c0_33 = arith.constant 0 : index
    %c0_34 = arith.constant 0 : index
    %98 = vector.load %arg14[%c0_33, %c0_34] : memref<1x4xf32, #tpu.memory_space<vmem>>, vector<1x4xf32>
    %99 = arith.addf %97, %98 : vector<1x4xf32>
    %c0_35 = arith.constant 0 : index
    %c0_36 = arith.constant 0 : index
    %c0_37 = arith.constant 0 : index
    %100 = vector.load %arg15[%c0_35, %c0_36, %c0_37] : memref<1x1x4xf32, #tpu.memory_space<vmem>>, vector<1x1x4xf32>
    %101 = vector.shape_cast %100 : vector<1x1x4xf32> to vector<1x4xf32>
    %102 = vector.shape_cast %99 : vector<1x4xf32> to vector<1x1x4xf32>
    tpu.vector_store %arg15[%c0_35, %c0_36, %c0_37], %102 {strides = array<i32>} : memref<1x1x4xf32, #tpu.memory_space<vmem>>, vector<1x1x4xf32>,
    return
  }
  func.func @transform_0(%arg0: i32) -> (i32, i32, i32) {
    %c0_i32 = arith.constant 0 : i32
    %c0_i32_0 = arith.constant 0 : i32
    %c0_i32_1 = arith.constant 0 : i32
    return %arg0, %c0_i32, %c0_i32_0 : i32, i32, i32
  }
  func.func @transform_1(%arg0: i32) -> (i32, i32) {
    %c0_i32 = arith.constant 0 : i32
    %c0_i32_0 = arith.constant 0 : i32
    %c0_i32_1 = arith.constant 0 : i32
    return %c0_i32, %c0_i32_0 : i32, i32
  }
  func.func @transform_2(%arg0: i32) -> (i32, i32) {
    %c0_i32 = arith.constant 0 : i32
    %c0_i32_0 = arith.constant 0 : i32
    %c0_i32_1 = arith.constant 0 : i32
    return %c0_i32, %c0_i32_0 : i32, i32
  }
  func.func @transform_3(%arg0: i32) -> (i32, i32) {
    %c0_i32 = arith.constant 0 : i32
    %c0_i32_0 = arith.constant 0 : i32
    %c0_i32_1 = arith.constant 0 : i32
    return %c0_i32, %c0_i32_0 : i32, i32
  }
  func.func @transform_4(%arg0: i32) -> (i32, i32) {
    %c0_i32 = arith.constant 0 : i32
    %c0_i32_0 = arith.constant 0 : i32
    %c0_i32_1 = arith.constant 0 : i32
    return %c0_i32, %c0_i32_0 : i32, i32
  }
  func.func @transform_5(%arg0: i32) -> (i32, i32) {
    %c0_i32 = arith.constant 0 : i32
    %c0_i32_0 = arith.constant 0 : i32
    %c0_i32_1 = arith.constant 0 : i32
    return %c0_i32, %c0_i32_0 : i32, i32
  }
  func.func @transform_6(%arg0: i32) -> (i32, i32) {
    %c0_i32 = arith.constant 0 : i32
    %c0_i32_0 = arith.constant 0 : i32
    %c0_i32_1 = arith.constant 0 : i32
    return %c0_i32, %c0_i32_0 : i32, i32
  }
  func.func @transform_7(%arg0: i32) -> (i32, i32) {
    %c0_i32 = arith.constant 0 : i32
    %c0_i32_0 = arith.constant 0 : i32
    %c0_i32_1 = arith.constant 0 : i32
    return %c0_i32, %c0_i32_0 : i32, i32
  }
  func.func @transform_8(%arg0: i32) -> (i32, i32) {
    %c0_i32 = arith.constant 0 : i32
    %c0_i32_0 = arith.constant 0 : i32
    %c0_i32_1 = arith.constant 0 : i32
    return %c0_i32, %c0_i32_0 : i32, i32
  }
  func.func @transform_9(%arg0: i32) -> (i32, i32) {
    %c0_i32 = arith.constant 0 : i32
    %c0_i32_0 = arith.constant 0 : i32
    %c0_i32_1 = arith.constant 0 : i32
    return %c0_i32, %c0_i32_0 : i32, i32
  }
  func.func @transform_10(%arg0: i32) -> (i32, i32) {
    %c0_i32 = arith.constant 0 : i32
    %c0_i32_0 = arith.constant 0 : i32
    %c0_i32_1 = arith.constant 0 : i32
    return %c0_i32, %c0_i32_0 : i32, i32
  }
  func.func @transform_11(%arg0: i32) -> (i32, i32) {
    %c0_i32 = arith.constant 0 : i32
    %c0_i32_0 = arith.constant 0 : i32
    %c0_i32_1 = arith.constant 0 : i32
    return %c0_i32, %c0_i32_0 : i32, i32
  }
  func.func @transform_12(%arg0: i32) -> (i32, i32) {
    %c0_i32 = arith.constant 0 : i32
    %c0_i32_0 = arith.constant 0 : i32
    %c0_i32_1 = arith.constant 0 : i32
    return %c0_i32, %c0_i32_0 : i32, i32
  }
  func.func @transform_13(%arg0: i32) -> (i32, i32) {
    %c0_i32 = arith.constant 0 : i32
    %c0_i32_0 = arith.constant 0 : i32
    %c0_i32_1 = arith.constant 0 : i32
    return %c0_i32, %c0_i32_0 : i32, i32
  }
  func.func @transform_14(%arg0: i32) -> (i32, i32, i32) {
    %c0_i32 = arith.constant 0 : i32
    %c0_i32_0 = arith.constant 0 : i32
    %c0_i32_1 = arith.constant 0 : i32
    return %arg0, %c0_i32, %c0_i32_0 : i32, i32, i32
  }
}

</mosaic_0001>

<bundles_post_ra>
// kernel: _lambda_.1
= control target key start
LH: loop header
LB: loop body
LE: loop exit
PB: predicated region body
PF: predicated region fallthrough
CT: control target
= control target key end

     0   :  { %s4107_s0 = inlined_call_operand.vmem [shape: bf16[2,384,6], index: 0, kind: input, shape index: {}]   ;;  %s4108_s1 = inlined_call_operand.vmem [shape: bf16[6,16], index: 1, kind: input, shape index: {}]   ;;  %s4109_s2 = inlined_call_operand.vmem [shape: f32[1,16], index: 2, kind: input, shape index: {}]   ;;  %s4110_s3 = inlined_call_operand.vmem [shape: f32[1,16], index: 3, kind: input, shape index: {}]   ;;  %s4111_s4 = inlined_call_operand.vmem [shape: f32[1,16], index: 4, kind: input, shape index: {}]   ;;  %s4112_s5 = inlined_call_operand.vmem [shape: bf16[240,64], index: 5, kind: input, shape index: {}]   ;;  %s4113_s6 = inlined_call_operand.vmem [shape: bf16[96,32], index: 6, kind: input, shape index: {}]   ;;  %s4114_s7 = inlined_call_operand.vmem [shape: f32[1,32], index: 7, kind: input, shape index: {}]   ;;  %s4115_s8 = inlined_call_operand.vmem [shape: f32[1,32], index: 8, kind: input, shape index: {}]   ;;  %s4116_s9 = inlined_call_operand.vmem [shape: f32[1,32], index: 9, kind: input, shape index: {}]   ;;  %s4117_s10 = inlined_call_operand.vmem [shape: bf16[448,80], index: 10, kind: input, shape index: {}]   ;;  %s4118_s11 = inlined_call_operand.vmem [shape: f32[1,80], index: 11, kind: input, shape index: {}]   ;;  %s4119_s12 = inlined_call_operand.vmem [shape: bf16[80,4], index: 12, kind: input, shape index: {}]   ;;  %s4120_s13 = inlined_call_operand.vmem [shape: f32[1,4], index: 13, kind: input, shape index: {}]   ;;  %s4121_s14 = inlined_call_operand.hbm [shape: f32[2,1,4], index: 14, kind: output, shape index: {}]  }
   0x1   :  { %4126 = sst [smem:[#allocation5_spill]] %s4107_s0 }
   0x2   :  { %4127 = sst [smem:[#allocation6_spill]] %s4108_s1 }
   0x3   :  { %4128 = sst [smem:[#allocation7_spill]] %s4109_s2 }
   0x4   :  { %4129 = sst [smem:[#allocation8_spill]] %s4110_s3 }
   0x5   :  { %19 = vsyncpa [#allocation3], 0 }
   0x6   :  { %21 = vsyncpa [#allocation3 + $0x1], 0  ;;  %s3293_s29 = smov 0   ;;  %s3295_s30 = smov 0  }
   0x7   :  { %s3297_s15 = smov 0   ;;  %s3299_s16 = smov 0  }
   0x8 LB: > { %s3314_s17 = sadd.s32 4294967295, %s3206_s16   ;;  %s2467_s18 = sadd.s32 4294967294, %s3206_s16   ;;  %s3206_s16 = sphi %s3299_s16, %s4141_s16   ;;  %s3202_s15 = sphi %s3297_s15, %s4140_s15   ;;  %s3198_s30 = sphi %s3295_s30, %s4139_s30   ;;  %s3194_s29 = sphi %s3293_s29, %s4138_s29  }
   0x9   : > { %s3318_s19 = sadd.s32 1, %s3206_s16   ;;  %s333_s20 = sadd.s32 1, %s3202_s15 }
   0xa   : > { %s330_s21 = ssub.s32 %s3206_s16, %s3318_s19  ;;  %p343_p0 = scmp.ne.s32.totalorder %s3202_s15, %s3198_s30 }
   0xb   : > { %p331_p1 = scmp.eq.s32.totalorder %s330_s21, 0  ;;  %p344_p2 = scmp.eq.s32.totalorder %s3314_s17, 1 }
   0xc   : > { %p349_p3 = scmp.ne.s32.totalorder %s3198_s30, %s3194_s29  ;;  %p350_p4 = scmp.eq.s32.totalorder %s2467_s18, 1 }
   0xd   : > { %s3329_s22 = scalar_select %p331_p1, %s3202_s15, %s333_s20  }
   0xe   : > { %p3331_p5 = por %p344_p2, %p343_p0  ;;  %p3335_p6 = por %p350_p4, %p349_p3 }
   0xf   : > { %p2470_p7 = scmp.ge.s32.totalorder %s3206_s16, 1  ;;  %p415_p8 = scmp.lt.s32.totalorder %s3206_s16, 3 }
  0x11   : > { %p416_p9 = pnand %p2470_p7, %p415_p8 }
  0x12   : > { %s4132_s1 = sld [smem:[#allocation6_spill]] (!%p416_p9)  ;;  %vm715_vm0 = vcmask (!%p416_p9), 1042432   ;;  %p460_p10 = scmp.lt.s32.totalorder (!%p416_p9), %s3314_s17, 1  ;;  %vm642_vm1 = vcmask (!%p416_p9), 48128   ;;  %v3208_v26 = vmov (!%p416_p9), 0.0   ;;  %vm3209_vm2 = vmmov (!%p416_p9), 0  }
  0x13   : > { %419 = sbr.rel (%p416_p9) target bundleno = 1609 (0x649), region = 76  ;;  %s4133_s0 = sld [smem:[#allocation5_spill]] (!%p416_p9)  ;;  %2740 = vmatprep.subr.bf16.mxu1 (!%p416_p9), %v3208_v26  ;;  %2748 = vmatprep.mubr.msk.bf16.mxu1 (!%p416_p9), %vm3209_vm2, %v3208_v26  ;;  %v3421_v49 = vld [vmem:[%s4111_s4] ss:$0 sm:$0xff] (!%p416_p9)  ;;  %vm1251_vm3 = vcmask (!%p416_p9), 523264   ;;  %vm1658_vm4 = vcmask (!%p416_p9), 130048  }
  0x14   : > { %s4134_s2 = sld [smem:[#allocation7_spill]] (!%p416_p9)  ;;  %s4135_s3 = sld [smem:[#allocation8_spill]] (!%p416_p9)  ;;  %vm1671_vm5 = vcmask (!%p416_p9), 261120   ;;  %vm1684_vm6 = vcmask (!%p416_p9), 392192   ;;  %vm1709_vm7 = vcmask (!%p416_p9), 654336   ;;  %vm1783_vm8 = vcmask (!%p416_p9), 785408  }
  0x15   : > { %s3210_s20 = smov (!%p416_p9), 16   ;;  %s3214_s25 = smov (!%p416_p9), 80   ;;  %vm2397_vm9 = vcmask (!%p416_p9), 24576  }
  0x16   : > { %s4136_s26 = smov (!%p416_p9), 32   ;;  %s3216_s18 = smov (!%p416_p9), 96  }
  0x18   : > { %v514_v0 = vld [vmem:[%s4132_s1] sm:$0x7] (!%p416_p9) }
  0x19   : > { %2846 = vmatprep.subr.msk.bf16.mxu0 (!%p416_p9), %vm715_vm0, %v514_v0  ;;  %v717_v1 = vsel (!%p416_p9), %vm715_vm0, %v514_v0, 0 }
  0x1a   : > { %2691 = vmatpush3.bf16.msra.mxu0 %v717_v1  ;;  %s461_s27 = scalar_select %p460_p10, %s3314_s17, 1  ;;  %v3405_v31 = vld [vmem:[%s4134_s2] ss:$0 sm:$0xff] }
  0x1b   : > { %v3414_v41 = vld [vmem:[%s4135_s3] ss:$0 sm:$0xff]  ;;  %s2603_s2 = sshll.u32 %s3314_s17, 4 }
  0x1c   : > { %s2847_s28 = smul.u32 192, %s461_s27  ;;  %s3212_s27 = smov 48  }
  0x1e   : > { %s3349_s21 = scalar_lea.vmem %s4133_s0, %s2847_s28  ;;  %s4137_s28 = smov 64  }
  0x1f   : > { %v3066_v2 = vld [vmem:[%s3349_s21] sm:$0xff]   ;;  %v3067_v3 = vld [vmem:[%s3349_s21 + $0x8] sm:$0xff]   ;;  %v3068_v4 = vld [vmem:[%s3349_s21 + $0x10] sm:$0xff]  }
  0x20   : > { %2692 = vmatprep.mubr.msk.bf16.mxu0 %vm642_vm1, %v3066_v2  ;;  %v3069_v5 = vld [vmem:[%s3349_s21 + $0x18] sm:$0xff]   ;;  %v3070_v6 = vld [vmem:[%s3349_s21 + $0x20] sm:$0xff]   ;;  %v3071_v7 = vld [vmem:[%s3349_s21 + $0x28] sm:$0xff]  }
  0x21   : > { %2693 = vmatmul.mubr.msk.bf16.vlgmr.msra.gmra.mrb[0].mxu0 %vm642_vm1, %v3067_v3  ;;  %v3072_v8 = vld [vmem:[%s3349_s21 + $0x30] sm:$0xff]   ;;  %v3073_v9 = vld [vmem:[%s3349_s21 + $0x38] sm:$0xff]   ;;  %v3074_v10 = vld [vmem:[%s3349_s21 + $0x40] sm:$0xff]  }
  0x22   : > { %2696 = vmatprep.mubr.msk.bf16.mxu0 %vm642_vm1, %v3068_v4  ;;  %v3075_v11 = vld [vmem:[%s3349_s21 + $0x48] sm:$0xff]   ;;  %v3076_v12 = vld [vmem:[%s3349_s21 + $0x50] sm:$0xff]   ;;  %v3077_v13 = vld [vmem:[%s3349_s21 + $0x58] sm:$0xff]  }
  0x23   : > { %v3078_v14 = vld [vmem:[%s3349_s21 + $0x60] sm:$0xff]   ;;  %v3079_v15 = vld [vmem:[%s3349_s21 + $0x68] sm:$0xff]   ;;  %v3080_v16 = vld [vmem:[%s3349_s21 + $0x70] sm:$0xff]  }
  0x24   : > { %v3081_v17 = vld [vmem:[%s3349_s21 + $0x78] sm:$0xff]   ;;  %v3082_v18 = vld [vmem:[%s3349_s21 + $0x80] sm:$0xff]   ;;  %v3083_v19 = vld [vmem:[%s3349_s21 + $0x88] sm:$0xff]  }
  0x25   : > { %v3084_v20 = vld [vmem:[%s3349_s21 + $0x90] sm:$0xff]   ;;  %v3085_v21 = vld [vmem:[%s3349_s21 + $0x98] sm:$0xff]   ;;  %v3086_v22 = vld [vmem:[%s3349_s21 + $0xa0] sm:$0xff]  }
  0x26   : > { %v3087_v23 = vld [vmem:[%s3349_s21 + $0xa8] sm:$0xff]   ;;  %v3088_v24 = vld [vmem:[%s3349_s21 + $0xb0] sm:$0xff]   ;;  %v3089_v25 = vld [vmem:[%s3349_s21 + $0xb8] sm:$0xff]   ;;  %s4122_s21 = smov 32  }
  0x29   : > { %2697 = vmatmul.mubr.msk.bf16.gmra.mrb[4].mxu0 %vm642_vm1, %v3069_v5 }
  0x2a   : > { %2700 = vmatprep.mubr.msk.bf16.mxu0 %vm642_vm1, %v3070_v6 }
  0x31   : > { %2701 = vmatmul.mubr.msk.bf16.gmra.mrb[8].mxu0 %vm642_vm1, %v3071_v7 }
  0x32   : > { %2704 = vmatprep.mubr.msk.bf16.mxu0 %vm642_vm1, %v3072_v8 }
  0x39   : > { %2705 = vmatmul.mubr.msk.bf16.gmra.mrb[12].mxu0 %vm642_vm1, %v3073_v9 }
  0x3a   : > { %2708 = vmatprep.mubr.msk.bf16.mxu0 %vm642_vm1, %v3074_v10 }
  0x41   : > { %2709 = vmatmul.mubr.msk.bf16.gmra.mrb[16].mxu0 %vm642_vm1, %v3075_v11 }
  0x42   : > { %2712 = vmatprep.mubr.msk.bf16.mxu0 %vm642_vm1, %v3076_v12 }
  0x49   : > { %2713 = vmatmul.mubr.msk.bf16.gmra.mrb[20].mxu0 %vm642_vm1, %v3077_v13 }
  0x4a   : > { %2716 = vmatprep.mubr.msk.bf16.mxu0 %vm642_vm1, %v3078_v14 }
  0x51   : > { %2717 = vmatmul.mubr.msk.bf16.gmra.mrb[24].mxu0 %vm642_vm1, %v3079_v15 }
  0x52   : > { %2720 = vmatprep.mubr.msk.bf16.mxu0 %vm642_vm1, %v3080_v16 }
  0x59   : > { %2721 = vmatmul.mubr.msk.bf16.gmra.mrb[28].mxu0 %vm642_vm1, %v3081_v17 }
  0x5a   : > { %2724 = vmatprep.mubr.msk.bf16.mxu0 %vm642_vm1, %v3082_v18 }
  0x61   : > { %2725 = vmatmul.mubr.msk.bf16.gmra.mrb[32].mxu0 %vm642_vm1, %v3083_v19 }
  0x62   : > { %2728 = vmatprep.mubr.msk.bf16.mxu0 %vm642_vm1, %v3084_v20 }
  0x69   : > { %2729 = vmatmul.mubr.msk.bf16.gmra.mrb[36].mxu0 %vm642_vm1, %v3085_v21 }
  0x6a   : > { %2732 = vmatprep.mubr.msk.bf16.mxu0 %vm642_vm1, %v3086_v22 }
  0x71   : > { %2733 = vmatmul.mubr.msk.bf16.gmra.mrb[40].mxu0 %vm642_vm1, %v3087_v23 }
  0x72   : > { %2736 = vmatprep.mubr.msk.bf16.mxu0 %vm642_vm1, %v3088_v24 }
  0x79   : > { %2737 = vmatmul.mubr.msk.bf16.gmra.mrb[44].mxu0 %vm642_vm1, %v3089_v25 }
  0xf4   : > { %v2694_v27 = vpop.f32.mrb[0].mxu0 }
  0xf5   : > { %v753_v28 = vpop.f32.mrb[1].mxu0  ;;  %v762_v33 = vadd.f32 %v2694_v27, %v3405_v31 }
  0xf6   : > { %v2695_v29 = vpop.f32.mrb[2].mxu0  ;;  %v754_v35 = vadd.f32 %v3405_v31, %v753_v28 }
  0xf7   : > { %v756_v30 = vpop.f32.mrb[3].mxu0  ;;  %v765_v37 = vadd.f32 %v2695_v29, %v3405_v31  ;;  %v946_v40 = vmax.f32 %v762_v33, 0.0 }
  0xf8   : > { %v757_v39 = vadd.f32 %v3405_v31, %v756_v30  ;;  %v944_v42 = vmax.f32 %v754_v35, 0.0 }
  0xf9   : > { %v947_v43 = vmax.f32 %v765_v37, 0.0  ;;  %v1001_v46 = vmul.f32 %v3414_v41, %v946_v40 }
  0xfa   : > { %v945_v44 = vmax.f32 %v757_v39, 0.0  ;;  %v999_v50 = vmul.f32 %v3414_v41, %v944_v42 }
  0xfb   : > { %v1002_v53 = vmul.f32 %v3414_v41, %v947_v43  ;;  %v3432_v62 = vadd.f32 %v3421_v49, %v1001_v46 }
  0xfc   : > { %v2698_v32 = vpop.f32.mrb[4].mxu0  ;;  %v1000_v58 = vmul.f32 %v3414_v41, %v945_v44  ;;  %v3437_v2 = vadd.f32 %v3421_v49, %v999_v50 }
  0xfd   : > { %v769_v34 = vpop.f32.mrb[5].mxu0  ;;  %v778_v54 = vadd.f32 %v2698_v32, %v3405_v31  ;;  %v3442_v6 = vadd.f32 %v3421_v49, %v1002_v53 }
  0xfe   : > { %v2699_v36 = vpop.f32.mrb[6].mxu0  ;;  %v770_v59 = vadd.f32 %v3405_v31, %v769_v34  ;;  %v3449_v10 = vadd.f32 %v3421_v49, %v1000_v58 }
  0xff   : > { %v772_v38 = vpop.f32.mrb[7].mxu0  ;;  %v781_v63 = vadd.f32 %v2699_v36, %v3405_v31  ;;  %v950_v7 = vmax.f32 %v778_v54, 0.0 }
 0x100   : > { %v773_v3 = vadd.f32 %v3405_v31, %v772_v38  ;;  %v948_v11 = vmax.f32 %v770_v59, 0.0 }
 0x101   : > { %v951_v15 = vmax.f32 %v781_v63, 0.0  ;;  %v1005_v25 = vmul.f32 %v3414_v41, %v950_v7 }
 0x102   : > { %v949_v20 = vmax.f32 %v773_v3, 0.0  ;;  %v1003_v32 = vmul.f32 %v3414_v41, %v948_v11 }
 0x103   : > { %v1006_v36 = vmul.f32 %v3414_v41, %v951_v15  ;;  %v1060_v43 = vadd.f32 %v3421_v49, %v1005_v25 }
 0x104   : > { %v2702_v45 = vpop.f32.mrb[8].mxu0  ;;  %v1004_v39 = vmul.f32 %v3414_v41, %v949_v20  ;;  %v1058_v46 = vadd.f32 %v3421_v49, %v1003_v32 }
 0x105   : > { %v794_v47 = vadd.f32 %v2702_v45, %v3405_v31  ;;  %v785_v48 = vpop.f32.mrb[9].mxu0 }
 0x106   : > { %v786_v51 = vadd.f32 %v3405_v31, %v785_v48  ;;  %v2703_v52 = vpop.f32.mrb[10].mxu0 }
 0x107   : > { %v954_v55 = vmax.f32 %v794_v47, 0.0  ;;  %v797_v56 = vadd.f32 %v2703_v52, %v3405_v31  ;;  %v788_v57 = vpop.f32.mrb[11].mxu0 }
 0x108   : > { %v952_v60 = vmax.f32 %v786_v51, 0.0  ;;  %v789_v61 = vadd.f32 %v3405_v31, %v788_v57  ;;  %v1061_v51 = vadd.f32 %v3421_v49, %v1006_v36 }
 0x109   : > { %v1009_v0 = vmul.f32 %v3414_v41, %v954_v55  ;;  %v955_v1 = vmax.f32 %v797_v56, 0.0  ;;  %v1059_v56 = vadd.f32 %v3421_v49, %v1004_v39 }
 0x10a   : > { %v1007_v4 = vmul.f32 %v3414_v41, %v952_v60  ;;  %v953_v5 = vmax.f32 %v789_v61, 0.0 }
 0x10b   : > { %v3445_v8 = vadd.f32 %v3421_v49, %v1009_v0  ;;  %v1010_v9 = vmul.f32 %v3414_v41, %v955_v1 }
 0x10c   : > { %v3452_v12 = vadd.f32 %v3421_v49, %v1007_v4  ;;  %v1008_v13 = vmul.f32 %v3414_v41, %v953_v5  ;;  %v2706_v14 = vpop.f32.mrb[12].mxu0 }
 0x10d   : > { %v1104_v16 = vmax.f32 %v3432_v62, %v3445_v8  ;;  %v3458_v17 = vadd.f32 %v3421_v49, %v1010_v9  ;;  %v810_v18 = vadd.f32 %v2706_v14, %v3405_v31  ;;  %v801_v19 = vpop.f32.mrb[13].mxu0 }
 0x10e   : > { %v1102_v21 = vmax.f32 %v3437_v2, %v3452_v12  ;;  %v3464_v22 = vadd.f32 %v3421_v49, %v1008_v13  ;;  %v802_v23 = vadd.f32 %v3405_v31, %v801_v19  ;;  %v2707_v24 = vpop.f32.mrb[14].mxu0 }
 0x10f   : > { %v1105_v27 = vmax.f32 %v3442_v6, %v3458_v17  ;;  %v958_v28 = vmax.f32 %v810_v18, 0.0  ;;  %v813_v29 = vadd.f32 %v2707_v24, %v3405_v31  ;;  %v804_v30 = vpop.f32.mrb[15].mxu0 }
 0x110   : > { %v1103_v33 = vmax.f32 %v3449_v10, %v3464_v22  ;;  %v956_v34 = vmax.f32 %v802_v23, 0.0  ;;  %v805_v35 = vadd.f32 %v3405_v31, %v804_v30 }
 0x111   : > { %v1013_v37 = vmul.f32 %v3414_v41, %v958_v28  ;;  %v959_v38 = vmax.f32 %v813_v29, 0.0 }
 0x112   : > { %v1011_v40 = vmul.f32 %v3414_v41, %v956_v34  ;;  %v957_v42 = vmax.f32 %v805_v35, 0.0 }
 0x113   : > { %v1068_v44 = vadd.f32 %v3421_v49, %v1013_v37  ;;  %v1014_v45 = vmul.f32 %v3414_v41, %v959_v38 }
 0x114   : > { %v1066_v47 = vadd.f32 %v3421_v49, %v1011_v40  ;;  %v1012_v48 = vmul.f32 %v3414_v41, %v957_v42  ;;  %v2710_v50 = vpop.f32.mrb[16].mxu0 }
 0x115   : > { %v1108_v52 = vmax.f32 %v1060_v43, %v1068_v44  ;;  %v1069_v53 = vadd.f32 %v3421_v49, %v1014_v45  ;;  %v826_v54 = vadd.f32 %v2710_v50, %v3405_v31  ;;  %v817_v55 = vpop.f32.mrb[17].mxu0 }
 0x116   : > { %v1106_v57 = vmax.f32 %v1058_v46, %v1066_v47  ;;  %v1067_v58 = vadd.f32 %v3421_v49, %v1012_v48  ;;  %v818_v59 = vadd.f32 %v3405_v31, %v817_v55  ;;  %v2711_v60 = vpop.f32.mrb[18].mxu0 }
 0x117   : > { %v1109_v61 = vmax.f32 %v1061_v51, %v1069_v53  ;;  %v962_v62 = vmax.f32 %v826_v54, 0.0  ;;  %v829_v63 = vadd.f32 %v2711_v60, %v3405_v31  ;;  %v820_v0 = vpop.f32.mrb[19].mxu0 }
 0x118   : > { %v1107_v1 = vmax.f32 %v1059_v56, %v1067_v58  ;;  %v960_v2 = vmax.f32 %v818_v59, 0.0  ;;  %v821_v3 = vadd.f32 %v3405_v31, %v820_v0 }
 0x119   : > { %v1017_v4 = vmul.f32 %v3414_v41, %v962_v62  ;;  %v963_v5 = vmax.f32 %v829_v63, 0.0 }
 0x11a   : > { %v1015_v6 = vmul.f32 %v3414_v41, %v960_v2  ;;  %v961_v7 = vmax.f32 %v821_v3, 0.0 }
 0x11b   : > { %v1072_v8 = vadd.f32 %v3421_v49, %v1017_v4  ;;  %v1018_v9 = vmul.f32 %v3414_v41, %v963_v5 }
 0x11c   : > { %v1070_v10 = vadd.f32 %v3421_v49, %v1015_v6  ;;  %v1016_v11 = vmul.f32 %v3414_v41, %v961_v7  ;;  %v2714_v12 = vpop.f32.mrb[20].mxu0 }
 0x11d   : > { %v3499_v13 = vmax.f32 %v1104_v16, %v1072_v8  ;;  %v1073_v14 = vadd.f32 %v3421_v49, %v1018_v9  ;;  %v842_v15 = vadd.f32 %v2714_v12, %v3405_v31  ;;  %v833_v17 = vpop.f32.mrb[21].mxu0 }
 0x11e   : > { %v3503_v18 = vmax.f32 %v1102_v21, %v1070_v10  ;;  %v1071_v19 = vadd.f32 %v3421_v49, %v1016_v11  ;;  %v834_v20 = vadd.f32 %v3405_v31, %v833_v17  ;;  %v2715_v22 = vpop.f32.mrb[22].mxu0 }
 0x11f   : > { %v3507_v23 = vmax.f32 %v1105_v27, %v1073_v14  ;;  %v966_v24 = vmax.f32 %v842_v15, 0.0  ;;  %v845_v25 = vadd.f32 %v2715_v22, %v3405_v31  ;;  %v836_v28 = vpop.f32.mrb[23].mxu0 }
 0x120   : > { %v3510_v16 = vmax.f32 %v1103_v33, %v1071_v19  ;;  %v964_v29 = vmax.f32 %v834_v20, 0.0  ;;  %v837_v30 = vadd.f32 %v3405_v31, %v836_v28 }
 0x121   : > { %v1021_v32 = vmul.f32 %v3414_v41, %v966_v24  ;;  %v967_v21 = vmax.f32 %v845_v25, 0.0 }
 0x122   : > { %v1019_v34 = vmul.f32 %v3414_v41, %v964_v29  ;;  %v965_v35 = vmax.f32 %v837_v30, 0.0 }
 0x123   : > { %v1076_v36 = vadd.f32 %v3421_v49, %v1021_v32  ;;  %v1022_v27 = vmul.f32 %v3414_v41, %v967_v21 }
 0x124   : > { %v1074_v37 = vadd.f32 %v3421_v49, %v1019_v34  ;;  %v1020_v38 = vmul.f32 %v3414_v41, %v965_v35  ;;  %v2718_v39 = vpop.f32.mrb[24].mxu0 }
 0x125   : > { %v3519_v33 = vmax.f32 %v1108_v52, %v1076_v36  ;;  %v1077_v40 = vadd.f32 %v3421_v49, %v1022_v27  ;;  %v858_v42 = vadd.f32 %v2718_v39, %v3405_v31  ;;  %v849_v43 = vpop.f32.mrb[25].mxu0 }
 0x126   : > { %v3523_v44 = vmax.f32 %v1106_v57, %v1074_v37  ;;  %v1075_v45 = vadd.f32 %v3421_v49, %v1020_v38  ;;  %v850_v46 = vadd.f32 %v3405_v31, %v849_v43  ;;  %v2719_v47 = vpop.f32.mrb[26].mxu0 }
 0x127   : > { %v3527_v48 = vmax.f32 %v1109_v61, %v1077_v40  ;;  %v970_v50 = vmax.f32 %v858_v42, 0.0  ;;  %v861_v51 = vadd.f32 %v2719_v47, %v3405_v31  ;;  %v852_v53 = vpop.f32.mrb[27].mxu0 }
 0x128   : > { %v3530_v52 = vmax.f32 %v1107_v1, %v1075_v45  ;;  %v968_v54 = vmax.f32 %v850_v46, 0.0  ;;  %v853_v55 = vadd.f32 %v3405_v31, %v852_v53 }
 0x129   : > { %v1025_v56 = vmul.f32 %v3414_v41, %v970_v50  ;;  %v971_v57 = vmax.f32 %v861_v51, 0.0 }
 0x12a   : > { %v1023_v58 = vmul.f32 %v3414_v41, %v968_v54  ;;  %v969_v59 = vmax.f32 %v853_v55, 0.0 }
 0x12b   : > { %v1080_v60 = vadd.f32 %v3421_v49, %v1025_v56  ;;  %v1026_v61 = vmul.f32 %v3414_v41, %v971_v57 }
 0x12c   : > { %v1078_v62 = vadd.f32 %v3421_v49, %v1023_v58  ;;  %v1024_v63 = vmul.f32 %v3414_v41, %v969_v59  ;;  %v2722_v0 = vpop.f32.mrb[28].mxu0 }
 0x12d   : > { %v1120_v1 = vmax.f32 %v3499_v13, %v1080_v60  ;;  %v1081_v2 = vadd.f32 %v3421_v49, %v1026_v61  ;;  %v874_v3 = vadd.f32 %v2722_v0, %v3405_v31  ;;  %v865_v4 = vpop.f32.mrb[29].mxu0 }
 0x12e   : > { %v1118_v5 = vmax.f32 %v3503_v18, %v1078_v62  ;;  %v1079_v6 = vadd.f32 %v3421_v49, %v1024_v63  ;;  %v866_v7 = vadd.f32 %v3405_v31, %v865_v4  ;;  %v2723_v8 = vpop.f32.mrb[30].mxu0 }
 0x12f   : > { %v1121_v9 = vmax.f32 %v3507_v23, %v1081_v2  ;;  %v974_v10 = vmax.f32 %v874_v3, 0.0  ;;  %v877_v11 = vadd.f32 %v2723_v8, %v3405_v31  ;;  %v868_v12 = vpop.f32.mrb[31].mxu0 }
 0x130   : > { %v1119_v13 = vmax.f32 %v3510_v16, %v1079_v6  ;;  %v972_v14 = vmax.f32 %v866_v7, 0.0  ;;  %v869_v15 = vadd.f32 %v3405_v31, %v868_v12 }
 0x131   : > { %v1029_v17 = vmul.f32 %v3414_v41, %v974_v10  ;;  %v975_v19 = vmax.f32 %v877_v11, 0.0 }
 0x132   : > { %v1027_v18 = vmul.f32 %v3414_v41, %v972_v14  ;;  %v973_v20 = vmax.f32 %v869_v15, 0.0 }
 0x133   : > { %v1084_v22 = vadd.f32 %v3421_v49, %v1029_v17  ;;  %v1030_v24 = vmul.f32 %v3414_v41, %v975_v19 }
 0x134   : > { %v1082_v23 = vadd.f32 %v3421_v49, %v1027_v18  ;;  %v1028_v25 = vmul.f32 %v3414_v41, %v973_v20  ;;  %v2726_v28 = vpop.f32.mrb[32].mxu0 }
 0x135   : > { %v1124_v16 = vmax.f32 %v3519_v33, %v1084_v22  ;;  %v1085_v29 = vadd.f32 %v3421_v49, %v1030_v24  ;;  %v890_v30 = vadd.f32 %v2726_v28, %v3405_v31  ;;  %v881_v32 = vpop.f32.mrb[33].mxu0 }
 0x136   : > { %v1122_v21 = vmax.f32 %v3523_v44, %v1082_v23  ;;  %v1083_v34 = vadd.f32 %v3421_v49, %v1028_v25  ;;  %v882_v35 = vadd.f32 %v3405_v31, %v881_v32  ;;  %v2727_v36 = vpop.f32.mrb[34].mxu0 }
 0x137   : > { %v1125_v27 = vmax.f32 %v3527_v48, %v1085_v29  ;;  %v978_v37 = vmax.f32 %v890_v30, 0.0  ;;  %v893_v38 = vadd.f32 %v2727_v36, %v3405_v31  ;;  %v884_v39 = vpop.f32.mrb[35].mxu0 }
 0x138   : > { %v1123_v33 = vmax.f32 %v3530_v52, %v1083_v34  ;;  %v976_v40 = vmax.f32 %v882_v35, 0.0  ;;  %v885_v42 = vadd.f32 %v3405_v31, %v884_v39 }
 0x139   : > { %v1033_v43 = vmul.f32 %v3414_v41, %v978_v37  ;;  %v979_v45 = vmax.f32 %v893_v38, 0.0 }
 0x13a   : > { %v1031_v44 = vmul.f32 %v3414_v41, %v976_v40  ;;  %v977_v46 = vmax.f32 %v885_v42, 0.0 }
 0x13b   : > { %v1088_v47 = vadd.f32 %v3421_v49, %v1033_v43  ;;  %v1034_v50 = vmul.f32 %v3414_v41, %v979_v45 }
 0x13c   : > { %v1086_v48 = vadd.f32 %v3421_v49, %v1031_v44  ;;  %v1032_v51 = vmul.f32 %v3414_v41, %v977_v46  ;;  %v2730_v53 = vpop.f32.mrb[36].mxu0 }
 0x13d   : > { %v3571_v54 = vmax.f32 %v1120_v1, %v1088_v47  ;;  %v1089_v52 = vadd.f32 %v3421_v49, %v1034_v50  ;;  %v906_v55 = vadd.f32 %v2730_v53, %v3405_v31  ;;  %v897_v56 = vpop.f32.mrb[37].mxu0 }
 0x13e   : > { %v1087_v57 = vadd.f32 %v3421_v49, %v1032_v51  ;;  %v898_v58 = vadd.f32 %v3405_v31, %v897_v56  ;;  %v2731_v59 = vpop.f32.mrb[38].mxu0  ;;  %v1126_v60 = vmax.f32 %v1118_v5, %v1086_v48 }
 0x13f   : > { %v1129_v61 = vmax.f32 %v1121_v9, %v1089_v52  ;;  %v982_v62 = vmax.f32 %v906_v55, 0.0  ;;  %v909_v63 = vadd.f32 %v2731_v59, %v3405_v31  ;;  %v900_v0 = vpop.f32.mrb[39].mxu0 }
 0x140   : > { %v980_v2 = vmax.f32 %v898_v58, 0.0  ;;  %v901_v1 = vadd.f32 %v3405_v31, %v900_v0  ;;  %v1127_v3 = vmax.f32 %v1119_v13, %v1087_v57 }
 0x141   : > { %v1037_v4 = vmul.f32 %v3414_v41, %v982_v62  ;;  %v983_v6 = vmax.f32 %v909_v63, 0.0 }
 0x142   : > { %v1035_v7 = vmul.f32 %v3414_v41, %v980_v2  ;;  %v981_v8 = vmax.f32 %v901_v1, 0.0 }
 0x143   : > { %v1092_v10 = vadd.f32 %v3421_v49, %v1037_v4  ;;  %v1038_v11 = vmul.f32 %v3414_v41, %v983_v6 }
 0x144   : > { %v1090_v5 = vadd.f32 %v3421_v49, %v1035_v7  ;;  %v1036_v9 = vmul.f32 %v3414_v41, %v981_v8  ;;  %v2734_v12 = vpop.f32.mrb[40].mxu0 }
 0x145   : > { %v1132_v14 = vmax.f32 %v1124_v16, %v1092_v10  ;;  %v1093_v15 = vadd.f32 %v3421_v49, %v1038_v11  ;;  %v922_v13 = vadd.f32 %v2734_v12, %v3405_v31  ;;  %v913_v17 = vpop.f32.mrb[41].mxu0  ;;  %v3092_v11 = vld [vmem:[%s4112_s5 + $0x10] sm:$0xff]   ;;  %v3095_v12 = vld [vmem:[%s4112_s5 + $0x28] sm:$0xff]  }
 0x146   : > { %v1130_v19 = vmax.f32 %v1122_v21, %v1090_v5  ;;  %v1091_v18 = vadd.f32 %v3421_v49, %v1036_v9  ;;  %v914_v20 = vadd.f32 %v3405_v31, %v913_v17  ;;  %v2735_v22 = vpop.f32.mrb[42].mxu0  ;;  %v3093_v5 = vld [vmem:[%s4112_s5 + $0x18] sm:$0xff]   ;;  %v3094_v9 = vld [vmem:[%s4112_s5 + $0x20] sm:$0xff]   ;;  %v3099_v17 = vld [vmem:[%s4112_s5 + $0x48] sm:$0xff]  }
 0x147   : > { %v1133_v24 = vmax.f32 %v1125_v27, %v1093_v15  ;;  %v986_v23 = vmax.f32 %v922_v13, 0.0  ;;  %v925_v25 = vadd.f32 %v2735_v22, %v3405_v31  ;;  %v916_v28 = vpop.f32.mrb[43].mxu0  ;;  %v3097_v15 = vld [vmem:[%s4112_s5 + $0x38] sm:$0xff]   ;;  %v3098_v13 = vld [vmem:[%s4112_s5 + $0x40] sm:$0xff]   ;;  %v3103_v22 = vld [vmem:[%s4112_s5 + $0x68] sm:$0xff]  }
 0x148   : > { %v1131_v29 = vmax.f32 %v1123_v33, %v1091_v18  ;;  %v984_v30 = vmax.f32 %v914_v20, 0.0  ;;  %v917_v16 = vadd.f32 %v3405_v31, %v916_v28  ;;  %v3101_v18 = vld [vmem:[%s4112_s5 + $0x58] sm:$0xff]   ;;  %v3102_v20 = vld [vmem:[%s4112_s5 + $0x60] sm:$0xff]  }
 0x149   : > { %v1041_v32 = vmul.f32 %v3414_v41, %v986_v23  ;;  %v987_v34 = vmax.f32 %v925_v25, 0.0  ;;  %v3105_v23 = vld [vmem:[%s4113_s6] sm:$0xff]  }
 0x14a   : > { %v1039_v35 = vmul.f32 %v3414_v41, %v984_v30  ;;  %v985_v21 = vmax.f32 %v917_v16, 0.0  ;;  %2808 = vmatprep.subr.bf16.mxu0 %v3105_v23 }
 0x14b   : > { %v1096_v36 = vadd.f32 %v3421_v49, %v1041_v32  ;;  %v1042_v37 = vmul.f32 %v3414_v41, %v987_v34  ;;  %2809 = vmatpush3.bf16.msra.mxu0 %v3105_v23 }
 0x14c   : > { %v1094_v27 = vadd.f32 %v3421_v49, %v1039_v35  ;;  %v1040_v38 = vmul.f32 %v3414_v41, %v985_v21  ;;  %v2738_v39 = vpop.f32.mrb[44].mxu0  ;;  %v3106_v35 = vld [vmem:[%s4113_s6 + $0x8] sm:$0xff]  }
 0x14d   : > { %v1097_v33 = vadd.f32 %v3421_v49, %v1042_v37  ;;  %v938_v40 = vadd.f32 %v2738_v39, %v3405_v31  ;;  %v929_v42 = vpop.f32.mrb[45].mxu0  ;;  %v1136_v43 = vmax.f32 %v3571_v54, %v1096_v36  ;;  %2810 = vmatprep.subr.bf16.mxu0 %v3106_v35 }
 0x14e   : > { %v1095_v45 = vadd.f32 %v3421_v49, %v1040_v38  ;;  %v930_v44 = vadd.f32 %v3405_v31, %v929_v42  ;;  %v2739_v46 = vpop.f32.mrb[46].mxu0  ;;  %v1134_v47 = vmax.f32 %v1126_v60, %v1094_v27 }
 0x14f   : > { %v990_v50 = vmax.f32 %v938_v40, 0.0  ;;  %v941_v48 = vadd.f32 %v2739_v46, %v3405_v31  ;;  %v932_v51 = vpop.f32.mrb[47].mxu0  ;;  %v1137_v53 = vmax.f32 %v1129_v61, %v1097_v33  ;;  %2811 = vmatpush3.bf16.msra.mxu0 %v3106_v35 }
 0x150   : > { %v988_v52 = vmax.f32 %v930_v44, 0.0  ;;  %v933_v55 = vadd.f32 %v3405_v31, %v932_v51  ;;  %v1135_v56 = vmax.f32 %v1127_v3, %v1095_v45  ;;  %v3107_v45 = vld [vmem:[%s4113_s6 + $0x10] sm:$0xff]  }
 0x151   : > { %v1045_v57 = vmul.f32 %v3414_v41, %v990_v50  ;;  %v991_v58 = vmax.f32 %v941_v48, 0.0  ;;  %v1173_v59 = vpack.c.bf16 %v1137_v53, %v1136_v43  ;;  %2812 = vmatprep.subr.bf16.mxu0 %v3107_v45 }
 0x152   : > { %v1043_v54 = vmul.f32 %v3414_v41, %v988_v52  ;;  %v989_v62 = vmax.f32 %v933_v55, 0.0  ;;  %v1172_v63 = vpack.c.bf16 %v1135_v56, %v1134_v47 }
 0x153   : > { %v1100_v0 = vadd.f32 %v3421_v49, %v1045_v57  ;;  %v1046_v60 = vmul.f32 %v3414_v41, %v991_v58  ;;  %2813 = vmatpush3.bf16.msra.mxu0 %v3107_v45 }
 0x154   : > { %v1098_v2 = vadd.f32 %v3421_v49, %v1043_v54  ;;  %v1044_v61 = vmul.f32 %v3414_v41, %v989_v62  ;;  %2741 = vmatpush3.bf16.msra.mxu1 %v1172_v63  ;;  %v3090_v41 = vld [vmem:[%s4112_s5] sm:$0xff]  }
 0x155   : > { %v1101_v31 = vadd.f32 %v3421_v49, %v1046_v60  ;;  %2742 = vmatprep.subr.bf16.mxu1 %v3208_v26  ;;  %v1140_v1 = vmax.f32 %v1132_v14, %v1100_v0  ;;  %v3096_v14 = vld [vmem:[%s4112_s5 + $0x30] sm:$0xff]  }
 0x156   : > { %v1099_v3 = vadd.f32 %v3421_v49, %v1044_v61  ;;  %v1138_v4 = vmax.f32 %v1130_v19, %v1098_v2  ;;  %v3091_v49 = vld [vmem:[%s4112_s5 + $0x8] sm:$0xff]   ;;  %v3100_v19 = vld [vmem:[%s4112_s5 + $0x50] sm:$0xff]   ;;  %v3109_v2 = vld [vmem:[%s4113_s6 + $0x20] sm:$0xff]  }
 0x157   : > { %v1141_v6 = vmax.f32 %v1133_v24, %v1101_v31  ;;  %v3104_v24 = vld [vmem:[%s4112_s5 + $0x70] sm:$0xff]   ;;  %v3110_v31 = vld [vmem:[%s4113_s6 + $0x28] sm:$0xff]  }
 0x158   : > { %2743 = vmatpush3.bf16.msra.mxu1 %v1173_v59  ;;  %v1139_v7 = vmax.f32 %v1131_v29, %v1099_v3  ;;  %v3108_v59 = vld [vmem:[%s4113_s6 + $0x18] sm:$0xff]  }
 0x159   : > { %2744 = vmatprep.subr.bf16.mxu1 %v3208_v26  ;;  %v1175_v8 = vpack.c.bf16 %v1141_v6, %v1140_v1  ;;  %2814 = vmatprep.subr.bf16.mxu0 %v3108_v59 }
 0x15a   : > { %v1174_v10 = vpack.c.bf16 %v1139_v7, %v1138_v4  ;;  %2815 = vmatpush3.bf16.msra.mxu0 %v3108_v59 }
 0x15b   : > { %2816 = vmatprep.subr.bf16.mxu0 %v3109_v2 }
 0x15c   : > { %2745 = vmatpush3.bf16.msra.mxu1 %v1174_v10 }
 0x15d   : > { %2746 = vmatprep.subr.bf16.mxu1 %v3208_v26 }
 0x15e   : > { %2817 = vmatpush3.bf16.msra.mxu0 %v3109_v2 }
 0x15f   : > { %2818 = vmatprep.subr.bf16.mxu0 %v3110_v31 }
 0x160   : > { %2747 = vmatpush3.bf16.msra.mxu1 %v1175_v8 }
 0x162   : > { %2819 = vmatpush3.bf16.msra.mxu0 %v3110_v31 }
 0x163   : > { %2749 = vmatmul.mubr.msk.bf16.vlgmr.msra.gmra.mrb[0].mxu1 %vm1251_vm3, %v3090_v41 }
 0x164   : > { %2752 = vmatprep.mubr.msk.bf16.mxu1 %vm3209_vm2, %v3208_v26 }
 0x16b   : > { %2753 = vmatmul.mubr.msk.bf16.gmra.mrb[4].mxu1 %vm1251_vm3, %v3091_v49 }
 0x16c   : > { %2756 = vmatprep.mubr.msk.bf16.mxu1 %vm3209_vm2, %v3208_v26 }
 0x173   : > { %2757 = vmatmul.mubr.msk.bf16.gmra.mrb[8].mxu1 %vm1251_vm3, %v3092_v11 }
 0x174   : > { %2760 = vmatprep.mubr.msk.bf16.mxu1 %vm3209_vm2, %v3208_v26 }
 0x17b   : > { %2761 = vmatmul.mubr.msk.bf16.gmra.mrb[12].mxu1 %vm1251_vm3, %v3093_v5 }
 0x17c   : > { %2764 = vmatprep.mubr.msk.bf16.mxu1 %vm3209_vm2, %v3208_v26 }
 0x183   : > { %2765 = vmatmul.mubr.msk.bf16.gmra.mrb[16].mxu1 %vm1251_vm3, %v3094_v9 }
 0x184   : > { %2768 = vmatprep.mubr.msk.bf16.mxu1 %vm3209_vm2, %v3208_v26 }
 0x18b   : > { %2769 = vmatmul.mubr.msk.bf16.gmra.mrb[20].mxu1 %vm1251_vm3, %v3095_v12 }
 0x18c   : > { %2772 = vmatprep.mubr.msk.bf16.mxu1 %vm3209_vm2, %v3208_v26 }
 0x193   : > { %2773 = vmatmul.mubr.msk.bf16.gmra.mrb[24].mxu1 %vm1251_vm3, %v3096_v14 }
 0x194   : > { %2776 = vmatprep.mubr.msk.bf16.mxu1 %vm3209_vm2, %v3208_v26 }
 0x19b   : > { %2777 = vmatmul.mubr.msk.bf16.gmra.mrb[28].mxu1 %vm1251_vm3, %v3097_v15 }
 0x19c   : > { %2780 = vmatprep.mubr.msk.bf16.mxu1 %vm3209_vm2, %v3208_v26 }
 0x1a3   : > { %2781 = vmatmul.mubr.msk.bf16.gmra.mrb[32].mxu1 %vm1251_vm3, %v3098_v13 }
 0x1a4   : > { %2784 = vmatprep.mubr.msk.bf16.mxu1 %vm3209_vm2, %v3208_v26 }
 0x1ab   : > { %2785 = vmatmul.mubr.msk.bf16.gmra.mrb[36].mxu1 %vm1251_vm3, %v3099_v17 }
 0x1ac   : > { %2788 = vmatprep.mubr.msk.bf16.mxu1 %vm3209_vm2, %v3208_v26 }
 0x1b3   : > { %2789 = vmatmul.mubr.msk.bf16.gmra.mrb[40].mxu1 %vm1251_vm3, %v3100_v19 }
 0x1b4   : > { %2792 = vmatprep.mubr.msk.bf16.mxu1 %vm3209_vm2, %v3208_v26 }
 0x1bb   : > { %2793 = vmatmul.mubr.msk.bf16.gmra.mrb[44].mxu1 %vm1251_vm3, %v3101_v18 }
 0x1bc   : > { %2796 = vmatprep.mubr.msk.bf16.mxu1 %vm3209_vm2, %v3208_v26 }
 0x1c3   : > { %2797 = vmatmul.mubr.msk.bf16.gmra.mrb[48].mxu1 %vm1251_vm3, %v3102_v20 }
 0x1c4   : > { %2800 = vmatprep.mubr.msk.bf16.mxu1 %vm3209_vm2, %v3208_v26 }
 0x1cb   : > { %2801 = vmatmul.mubr.msk.bf16.gmra.mrb[52].mxu1 %vm1251_vm3, %v3103_v22 }
 0x1cc   : > { %2804 = vmatprep.mubr.msk.bf16.mxu1 %vm3209_vm2, %v3208_v26 }
 0x1d3   : > { %2805 = vmatmul.mubr.msk.bf16.gmra.mrb[56].mxu1 %vm1251_vm3, %v3104_v24 }
 0x236   : > { %v3706_v25 = vpop.f32.mrb[0].mxu1 }
 0x237   : > { %v2750_v28 = vpop.f32.mrb[1].mxu1 }
 0x238   : > { %v3708_v29 = vpop.f32.mrb[2].mxu1 }
 0x239   : > { %v2751_v30 = vpop.f32.mrb[3].mxu1 }
 0x23e   : > { %v3710_v16 = vpop.f32.mrb[4].mxu1 }
 0x23f   : > { %v2754_v32 = vpop.f32.mrb[5].mxu1 }
 0x240   : > { %v3712_v34 = vpop.f32.mrb[6].mxu1 }
 0x241   : > { %v2755_v21 = vpop.f32.mrb[7].mxu1  ;;  %v2896_v36 = vpack.i.bf16 %v3712_v34, %v3710_v16 }
 0x243   : > { %2897 = vrot.lane.b32.xlu0 %v2896_v36, %s3210_s20 }
 0x246   : > { %v3720_v37 = vpop.f32.mrb[8].mxu1 }
 0x247   : > { %v2758_v27 = vpop.f32.mrb[9].mxu1 }
 0x248   : > { %v3722_v38 = vpop.f32.mrb[10].mxu1 }
 0x249   : > { %v2901_v39 = vpack.i.bf16 %v3722_v38, %v3720_v37  ;;  %v2759_v33 = vpop.f32.mrb[11].mxu1 }
 0x24b   : > { %2907 = vrot.lane.b32.xlu1 %v2901_v39, %s4122_s21  ;;  %2902 = vrot.lane.b32.xlu0 %v2901_v39, %s3210_s20 }
 0x24e   : > { %v1355_v40 = vpop.f32.mrb[12].mxu1 }
 0x24f   : > { %v2762_v42 = vpop.f32.mrb[13].mxu1 }
 0x250   : > { %v1358_v43 = vpop.f32.mrb[14].mxu1 }
 0x251   : > { %v2916_v44 = vpack.i.bf16 %v1358_v43, %v1355_v40  ;;  %v2763_v46 = vpop.f32.mrb[15].mxu1 }
 0x253   : > { %2917 = vrot.lane.b32.xlu0 %v2916_v44, %s3210_s20  ;;  %2912 = vrot.lane.b32.xlu1 %v2916_v44, %s4122_s21 }
 0x256   : > { %v1363_v47 = vpop.f32.mrb[16].mxu1 }
 0x257   : > { %v2766_v50 = vpop.f32.mrb[17].mxu1 }
 0x258   : > { %v1366_v48 = vpop.f32.mrb[18].mxu1 }
 0x259   : > { %v2921_v51 = vpack.i.bf16 %v1366_v48, %v1363_v47  ;;  %v2767_v53 = vpop.f32.mrb[19].mxu1 }
 0x25b   : > { %2922 = vrot.lane.b32.xlu0 %v2921_v51, %s4122_s21  ;;  %s4124_s21 = smov 64  }
 0x25e   : > { %v3734_v52 = vpop.f32.mrb[20].mxu1 }
 0x25f   : > { %v2770_v55 = vpop.f32.mrb[21].mxu1 }
 0x260   : > { %v3736_v56 = vpop.f32.mrb[22].mxu1 }
 0x261   : > { %v2926_v57 = vpack.i.bf16 %v3736_v56, %v3734_v52  ;;  %v2771_v58 = vpop.f32.mrb[23].mxu1 }
 0x263   : > { %2927 = vrot.lane.b32.xlu0 %v2926_v57, %s3212_s27 }
 0x266   : > { %v3744_v54 = vpop.f32.mrb[24].mxu1 }
 0x267   : > { %v2774_v62 = vpop.f32.mrb[25].mxu1 }
 0x268   : > { %v3746_v63 = vpop.f32.mrb[26].mxu1 }
 0x269   : > { %v2775_v0 = vpop.f32.mrb[27].mxu1  ;;  %v2936_v60 = vpack.i.bf16 %v3746_v63, %v3744_v54 }
 0x26b   : > { %2937 = vrot.lane.b32.xlu0 %v2936_v60, %s4124_s21  ;;  %2932 = vrot.lane.b32.xlu1 %v2936_v60, %s3212_s27 }
 0x26e   : > { %v3755_v61 = vpop.f32.mrb[28].mxu1 }
 0x26f   : > { %2942 = vrot.lane.b32.xlu1 %v2936_v60, %s3210_s20  ;;  %v2778_v1 = vpop.f32.mrb[29].mxu1 }
 0x270   : > { %v3761_v3 = vpop.f32.mrb[30].mxu1 }
 0x271   : > { %v2779_v4 = vpop.f32.mrb[31].mxu1  ;;  %v2951_v6 = vpack.i.bf16 %v3761_v3, %v3755_v61 }
 0x273   : > { %2952 = vrot.lane.b32.xlu0 %v2951_v6, %s3214_s25  ;;  %2947 = vrot.lane.b32.xlu1 %v2951_v6, %s4124_s21 }
 0x276   : > { %v1395_v7 = vpop.f32.mrb[32].mxu1 }
 0x277   : > { %2962 = vrot.lane.b32.xlu0 %v2951_v6, %s3212_s27  ;;  %2957 = vrot.lane.b32.xlu1 %v2951_v6, %s4136_s26  ;;  %v2782_v8 = vpop.f32.mrb[33].mxu1 }
 0x278   : > { %v1398_v10 = vpop.f32.mrb[34].mxu1 }
 0x279   : > { %v2783_v41 = vpop.f32.mrb[35].mxu1  ;;  %v2971_v49 = vpack.i.bf16 %v1398_v10, %v1395_v7 }
 0x27b   : > { %2967 = vrot.lane.b32.xlu0 %v2951_v6, %s3210_s20  ;;  %2972 = vrot.lane.b32.xlu1 %v2971_v49, %s3214_s25 }
 0x27e   : > { %v1403_v11 = vpop.f32.mrb[36].mxu1 }
 0x27f   : > { %2977 = vrot.lane.b32.xlu0 %v2971_v49, %s4124_s21  ;;  %2982 = vrot.lane.b32.xlu1 %v2971_v49, %s3210_s20  ;;  %v2786_v5 = vpop.f32.mrb[37].mxu1 }
 0x280   : > { %v1406_v9 = vpop.f32.mrb[38].mxu1 }
 0x281   : > { %v2996_v12 = vpack.i.bf16 %v1406_v9, %v1403_v11  ;;  %v2787_v14 = vpop.f32.mrb[39].mxu1 }
 0x283   : > { %2987 = vrot.lane.b32.xlu0 %v2971_v49, %s4136_s26  ;;  %2997 = vrot.lane.b32.xlu1 %v2996_v12, %s4136_s26 }
 0x286   : > { %v1411_v15 = vpop.f32.mrb[40].mxu1 }
 0x287   : > { %2992 = vrot.lane.b32.xlu0 %v2996_v12, %s3214_s25  ;;  %v2790_v13 = vpop.f32.mrb[41].mxu1 }
 0x288   : > { %v1414_v17 = vpop.f32.mrb[42].mxu1 }
 0x289   : > { %v3001_v19 = vpack.i.bf16 %v1414_v17, %v1411_v15  ;;  %v2791_v18 = vpop.f32.mrb[43].mxu1 }
 0x28b   : > { %3002 = vrot.lane.b32.xlu1 %v3001_v19, %s3212_s27 }
 0x28e   : > { %v1419_v20 = vpop.f32.mrb[44].mxu1 }
 0x28f   : > { %v2794_v22 = vpop.f32.mrb[45].mxu1 }
 0x290   : > { %v1422_v24 = vpop.f32.mrb[46].mxu1 }
 0x291   : > { %v3011_v23 = vpack.i.bf16 %v1422_v24, %v1419_v20  ;;  %v2795_v28 = vpop.f32.mrb[47].mxu1 }
 0x293   : > { %3012 = vrot.lane.b32.xlu0 %v3011_v23, %s3212_s27  ;;  %3007 = vrot.lane.b32.xlu1 %v3011_v23, %s4124_s21 }
 0x296   : > { %v1427_v30 = vpop.f32.mrb[48].mxu1 }
 0x297   : > { %v2798_v32 = vpop.f32.mrb[49].mxu1 }
 0x298   : > { %v1430_v35 = vpop.f32.mrb[50].mxu1 }
 0x299   : > { %v3026_v21 = vpack.i.bf16 %v1430_v35, %v1427_v30  ;;  %v2799_v36 = vpop.f32.mrb[51].mxu1 }
 0x29b   : > { %3027 = vrot.lane.b32.xlu0 %v3026_v21, %s4124_s21  ;;  %3017 = vrot.lane.b32.xlu1 %v3026_v21, %s3214_s25 }
 0x29e   : > { %v1435_v27 = vpop.f32.mrb[52].mxu1 }
 0x29f   : > { %3022 = vrot.lane.b32.xlu1 %v3026_v21, %s3212_s27  ;;  %v2802_v39 = vpop.f32.mrb[53].mxu1 }
 0x2a0   : > { %v1438_v33 = vpop.f32.mrb[54].mxu1 }
 0x2a1   : > { %v3036_v40 = vpack.i.bf16 %v1438_v33, %v1435_v27  ;;  %v2803_v42 = vpop.f32.mrb[55].mxu1 }
 0x2a3   : > { %3037 = vrot.lane.b32.xlu0 %v3036_v40, %s3214_s25  ;;  %3032 = vrot.lane.b32.xlu1 %v3036_v40, %s4124_s21  ;;  %s458_s21 = sand.u32 1, %s3198_s30  }
 0x2a4   : > { %s459_s3 = scalar_lea.vmem [#allocation2], %s458_s21  ;;  %s2400_s17 = scalar_lea.sflag [#allocation3], %s458_s21 }
 0x2a6   : > { %v1443_v43 = vpop.f32.mrb[56].mxu1 }
 0x2a7   : > { %v2806_v45 = vpop.f32.mrb[57].mxu1 }
 0x2a8   : > { %v1446_v44 = vpop.f32.mrb[58].mxu1 }
 0x2a9   : > { %v3041_v46 = vpack.i.bf16 %v1446_v44, %v1443_v43  ;;  %v2807_v47 = vpop.f32.mrb[59].mxu1 }
 0x2ab   : > { %3042 = vrot.lane.b32.xlu1 %v3041_v46, %s3214_s25  ;;  %s2412_s25 = sshll.u32 %s459_s3, 4  ;;  %s4067_s25 = int_to_ptr.vmem [resolvable:$true] %s2412_s25 }
 0x2b5   : > { %v2898_v50 = vpop.permute.xlu0 %2897 }
 0x2b6   : > { %v2900_v62 = vunpack.i.h.bf16 %v2898_v50  ;;  %v2899_v0 = vunpack.i.l.bf16 %v2898_v50 }
 0x2b8   : > { %v1660_v10 = vsel %vm1658_vm4, %v3708_v29, %v2900_v62  ;;  %v1659_v41 = vsel %vm1658_vm4, %v3706_v25, %v2899_v0 }
 0x2bd   : > { %v2903_v48 = vpop.permute.xlu0 %2902  ;;  %v2908_v53 = vpop.permute.xlu1 %2907 }
 0x2be   : > { %v2910_v2 = vunpack.i.h.bf16 %v2908_v53  ;;  %v2909_v31 = vunpack.i.l.bf16 %v2908_v53  ;;  %v2905_v19 = vunpack.i.h.bf16 %v2903_v48  ;;  %v2904_v25 = vunpack.i.l.bf16 %v2903_v48 }
 0x2c0   : > { %v1673_v49 = vsel %vm1671_vm5, %v1660_v10, %v2910_v2  ;;  %v1672_v11 = vsel %vm1671_vm5, %v1659_v41, %v2909_v31  ;;  %v1662_v27 = vsel %vm1658_vm4, %v3712_v34, %v2905_v19  ;;  %v1661_v39 = vsel %vm1658_vm4, %v3710_v16, %v2904_v25 }
 0x2c5   : > { %v3785_v51 = vpop.permute.xlu0 %2917  ;;  %v2913_v57 = vpop.permute.xlu1 %2912 }
 0x2c6   : > { %v2915_v22 = vunpack.i.h.bf16 %v2913_v57  ;;  %v2914_v24 = vunpack.i.l.bf16 %v2913_v57 }
 0x2c8   : > { %v1675_v33 = vsel %vm1671_vm5, %v1662_v27, %v2915_v22  ;;  %v1674_v40 = vsel %vm1671_vm5, %v1661_v39, %v2914_v24 }
 0x2cd   : > { %v3787_v55 = vpop.permute.xlu0 %2922 }
 0x2ce   : > { %v2925_v62 = vunpack.i.h.bf16 %v3787_v55  ;;  %v2924_v0 = vunpack.i.l.bf16 %v3787_v55 }
 0x2d5   : > { %v2928_v58 = vpop.permute.xlu0 %2927 }
 0x2d6   : > { %v2930_v4 = vunpack.i.h.bf16 %v2928_v58  ;;  %v2929_v6 = vunpack.i.l.bf16 %v2928_v58  ;;  %v2920_v58 = vunpack.i.h.bf16 %v3785_v51 }
 0x2d8   : > { %v1686_v12 = vsel %vm1684_vm6, %v1673_v49, %v2930_v4  ;;  %v1685_v14 = vsel %vm1684_vm6, %v1672_v11, %v2929_v6 }
 0x2dd   : > { %v2933_v59 = vpop.permute.xlu1 %2932  ;;  %v2938_v60 = vpop.permute.xlu0 %2937 }
 0x2de   : > { %v2940_v7 = vunpack.i.h.bf16 %v2938_v60  ;;  %v2939_v8 = vunpack.i.l.bf16 %v2938_v60  ;;  %v2935_v32 = vunpack.i.h.bf16 %v2933_v59  ;;  %v2934_v35 = vunpack.i.l.bf16 %v2933_v59 }
 0x2df   : > { %v2919_v59 = vunpack.i.l.bf16 %v3785_v51 }
 0x2e0   : > { %v1698_v17 = vsel %vm1251_vm3, %v1686_v12, %v2940_v7  ;;  %v1697_v29 = vsel %vm1251_vm3, %v1685_v14, %v2939_v8  ;;  %v1688_v45 = vsel %vm1684_vm6, %v1675_v33, %v2935_v32  ;;  %v1687_v44 = vsel %vm1684_vm6, %v1674_v40, %v2934_v35 }
 0x2e1   : > { %v3789_v1 = vpop.permute.xlu1 %2942  ;;  %v1664_v7 = vsel %vm1658_vm4, %v3722_v38, %v2920_v58  ;;  %v1663_v8 = vsel %vm1658_vm4, %v3720_v37, %v2919_v59 }
 0x2e2   : > { %v1677_v10 = vsel %vm1671_vm5, %v1664_v7, %v2925_v62  ;;  %v1676_v51 = vsel %vm1671_vm5, %v1663_v8, %v2924_v0  ;;  %v2944_v19 = vunpack.i.l.bf16 %v3789_v1 }
 0x2e4   : > { %v1665_v35 = vsel %vm1658_vm4, %v3734_v52, %v2944_v19 }
 0x2e5   : > { %v2953_v5 = vpop.permute.xlu0 %2952  ;;  %v2948_v9 = vpop.permute.xlu1 %2947 }
 0x2e6   : > { %v2955_v15 = vunpack.i.h.bf16 %v2953_v5  ;;  %v2954_v13 = vunpack.i.l.bf16 %v2953_v5  ;;  %v2950_v21 = vunpack.i.h.bf16 %v2948_v9  ;;  %v2949_v36 = vunpack.i.l.bf16 %v2948_v9 }
 0x2e8   : > { %v1711_v18 = vsel %vm1709_vm7, %v1698_v17, %v2955_v15  ;;  %v1710_v20 = vsel %vm1709_vm7, %v1697_v29, %v2954_v13  ;;  %v1700_v50 = vsel %vm1251_vm3, %v1688_v45, %v2950_v21  ;;  %v1699_v34 = vsel %vm1251_vm3, %v1687_v44, %v2949_v36 }
 0x2e9   : > { %v1722_v23 = vpack.c.bf16 %v1711_v18, %v1710_v20  ;;  %v2963_v28 = vpop.permute.xlu0 %2962  ;;  %v3803_v30 = vpop.permute.xlu1 %2957  ;;  %v2945_v29 = vunpack.i.h.bf16 %v3789_v1 }
 0x2ea   : > { %v2965_v2 = vunpack.i.h.bf16 %v2963_v28  ;;  %v2964_v31 = vunpack.i.l.bf16 %v2963_v28  ;;  %v2960_v18 = vunpack.i.h.bf16 %v3803_v30  ;;  %v2959_v20 = vunpack.i.l.bf16 %v3803_v30 }
 0x2eb   : > { %2820 = vmatprep.mubr.msk.bf16.mxu0 %vm1783_vm8, %v1722_v23  ;;  %v1666_v32 = vsel %vm1658_vm4, %v3736_v56, %v2945_v29 }
 0x2ec   : > { %v1690_v49 = vsel %vm1684_vm6, %v1677_v10, %v2965_v2  ;;  %v1689_v55 = vsel %vm1684_vm6, %v1676_v51, %v2964_v31  ;;  %v1679_v36 = vsel %vm1671_vm5, %v1666_v32, %v2960_v18  ;;  %v1678_v1 = vsel %vm1671_vm5, %v1665_v35, %v2959_v20  ;;  %v3112_v35 = vld [vmem:[%s4117_s10 + $0x88] sm:$0xff]  }
 0x2ed   : > { %v3812_v42 = vpop.permute.xlu0 %2967  ;;  %v2973_v43 = vpop.permute.xlu1 %2972  ;;  %v3215_v32 = vmov 0  }
 0x2ee   : > { %v2975_v46 = vunpack.i.h.bf16 %v2973_v43  ;;  %v2974_v47 = vunpack.i.l.bf16 %v2973_v43  ;;  %v2970_v56 = vunpack.i.h.bf16 %v3812_v42  ;;  %v2969_v52 = vunpack.i.l.bf16 %v3812_v42  ;;  %2271 = vmatprep.subr.bf16.mxu1 %v3215_v32 }
 0x2f0   : > { %v1713_v48 = vsel %vm1709_vm7, %v1700_v50, %v2975_v46  ;;  %v1712_v16 = vsel %vm1709_vm7, %v1699_v34, %v2974_v47  ;;  %v1668_v42 = vsel %vm1658_vm4, %v3746_v63, %v2970_v56  ;;  %v1667_v62 = vsel %vm1658_vm4, %v3744_v54, %v2969_v52  ;;  %v3128_v56 = vld [vmem:[%s4117_s10 + $0x18] sm:$0xff]   ;;  %v3129_v52 = vld [vmem:[%s4117_s10 + $0x60] sm:$0xff]  }
 0x2f1   : > { %v1723_v53 = vpack.c.bf16 %v1713_v48, %v1712_v16  ;;  %v2978_v57 = vpop.permute.xlu0 %2977  ;;  %v3835_v11 = vpop.permute.xlu1 %2982 }
 0x2f2   : > { %v2980_v4 = vunpack.i.h.bf16 %v2978_v57  ;;  %v2979_v6 = vunpack.i.l.bf16 %v2978_v57  ;;  %v2985_v63 = vunpack.i.h.bf16 %v3835_v11  ;;  %v2984_v51 = vunpack.i.l.bf16 %v3835_v11 }
 0x2f3   : > { %2821 = vmatmul.mubr.msk.bf16.vlgmr.msra.gmra.mrb[48].mxu0 %vm1783_vm8, %v1723_v53 }
 0x2f4   : > { %v1702_v12 = vsel %vm1251_vm3, %v1690_v49, %v2980_v4  ;;  %v1701_v38 = vsel %vm1251_vm3, %v1689_v55, %v2979_v6  ;;  %v1669_v11 = vsel %vm1658_vm4, %v3755_v61, %v2984_v51 }
 0x2f5   : > { %v3825_v60 = vpop.permute.xlu0 %2987  ;;  %v3842_v13 = vpop.permute.xlu1 %2997 }
 0x2f6   : > { %v2990_v50 = vunpack.i.h.bf16 %v3825_v60  ;;  %v2989_v34 = vunpack.i.l.bf16 %v3825_v60  ;;  %v3000_v55 = vunpack.i.h.bf16 %v3842_v13 }
 0x2f8   : > { %v1681_v0 = vsel %vm1671_vm5, %v1668_v42, %v2990_v50  ;;  %v1680_v2 = vsel %vm1671_vm5, %v1667_v62, %v2989_v34  ;;  %v3117_v50 = vld [vmem:[%s4117_s10 + $0xb0] sm:$0xff]   ;;  %v3133_v34 = vld [vmem:[%s4117_s10 + $0x28] sm:$0xff]  }
 0x2f9   : > { %v2993_v41 = vpop.permute.xlu0 %2992 }
 0x2fa   : > { %v2995_v5 = vunpack.i.h.bf16 %v2993_v41  ;;  %v2994_v9 = vunpack.i.l.bf16 %v2993_v41 }
 0x2fc   : > { %v1715_v14 = vsel %vm1709_vm7, %v1702_v12, %v2995_v5  ;;  %v1714_v37 = vsel %vm1709_vm7, %v1701_v38, %v2994_v9  ;;  %v2999_v5 = vunpack.i.l.bf16 %v3842_v13 }
 0x2fd   : > { %v1724_v15 = vpack.c.bf16 %v1715_v14, %v1714_v37  ;;  %v3003_v17 = vpop.permute.xlu1 %3002 }
 0x2fe   : > { %v3005_v22 = vunpack.i.h.bf16 %v3003_v17  ;;  %v3004_v24 = vunpack.i.l.bf16 %v3003_v17  ;;  %v1682_v29 = vsel %vm1671_vm5, %v1669_v11, %v2999_v5 }
 0x2ff   : > { %2824 = vmatprep.mubr.msk.bf16.mxu0 %vm1783_vm8, %v1724_v15  ;;  %v1670_v15 = vsel %vm1658_vm4, %v3761_v3, %v2985_v63 }
 0x300   : > { %v1692_v39 = vsel %vm1684_vm6, %v1679_v36, %v3005_v22  ;;  %v1691_v30 = vsel %vm1684_vm6, %v1678_v1, %v3004_v24  ;;  %v1683_v17 = vsel %vm1671_vm5, %v1670_v15, %v3000_v55  ;;  %v3121_v36 = vld [vmem:[%s4117_s10] sm:$0xff]   ;;  %v3122_v1 = vld [vmem:[%s4117_s10 + $0x48] sm:$0xff]  }
 0x305   : > { %v3008_v25 = vpop.permute.xlu1 %3007  ;;  %v3013_v21 = vpop.permute.xlu0 %3012 }
 0x306   : > { %v3010_v23 = vunpack.i.h.bf16 %v3008_v25  ;;  %v3009_v28 = vunpack.i.l.bf16 %v3008_v25  ;;  %v3015_v16 = vunpack.i.h.bf16 %v3013_v21  ;;  %v3014_v53 = vunpack.i.l.bf16 %v3013_v21  ;;  %v3120_v21 = vld [vmem:[%s4117_s10 + $0x40] sm:$0xff]  }
 0x307   : > { %2662 = vmatprep.subr.bf16.mxu0 %v3120_v21 }
 0x308   : > { %v1704_v43 = vsel %vm1251_vm3, %v1692_v39, %v3010_v23  ;;  %v1703_v45 = vsel %vm1251_vm3, %v1691_v30, %v3009_v28  ;;  %v1694_v60 = vsel %vm1684_vm6, %v1681_v0, %v3015_v16  ;;  %v1693_v4 = vsel %vm1684_vm6, %v1680_v2, %v3014_v53  ;;  %v3111_v28 = vld [vmem:[%s4117_s10 + $0x80] sm:$0xff]   ;;  %2663 = vmatpush3.bf16.msra.mxu0 %v3121_v36  ;;  %v3123_v39 = vld [vmem:[%s4117_s10 + $0x8] sm:$0xff]   ;;  %v3125_v30 = vld [vmem:[%s4117_s10 + $0x50] sm:$0xff]  }
 0x309   : > { %2272 = vmatpush1.bf16.msra.mxu1 %v3111_v28  ;;  %2664 = vmatprep.subr.bf16.mxu0 %v3122_v1  ;;  %v3119_v16 = vld [vmem:[%s4117_s10 + $0xc0] sm:$0xff]   ;;  %v3124_v53 = vld [vmem:[%s4117_s10 + $0xc8] sm:$0xff]  }
 0x30a   : > { %2273 = vmatprep.subr.bf16.mxu1 %v3215_v32  ;;  %v3970_v0 = vld [vmem:[%s4115_s8] ss:$0 sm:$0xff] }
 0x30c   : > { %2665 = vmatpush3.bf16.msra.mxu0 %v3123_v39 }
 0x30d   : > { %v3018_v27 = vpop.permute.xlu1 %3017  ;;  %v3028_v44 = vpop.permute.xlu0 %3027  ;;  %2274 = vmatpush1.bf16.msra.mxu1 %v3112_v35  ;;  %2666 = vmatprep.subr.bf16.mxu0 %v3125_v30 }
 0x30e   : > { %v3020_v33 = vunpack.i.h.bf16 %v3018_v27  ;;  %v3019_v40 = vunpack.i.l.bf16 %v3018_v27  ;;  %v3030_v58 = vunpack.i.h.bf16 %v3028_v44  ;;  %v3029_v59 = vunpack.i.l.bf16 %v3028_v44  ;;  %v3113_v27 = vld [vmem:[%s4117_s10 + $0x90] sm:$0xff]   ;;  %2275 = vmatprep.subr.bf16.mxu1 %v3215_v32  ;;  %v3116_v44 = vld [vmem:[%s4117_s10 + $0xa8] sm:$0xff]  }
 0x310   : > { %v1717_v46 = vsel %vm1709_vm7, %v1704_v43, %v3020_v33  ;;  %v1716_v47 = vsel %vm1709_vm7, %v1703_v45, %v3019_v40  ;;  %v1706_v8 = vsel %vm1251_vm3, %v1694_v60, %v3030_v58  ;;  %v1705_v10 = vsel %vm1251_vm3, %v1693_v4, %v3029_v59  ;;  %v3114_v33 = vld [vmem:[%s4117_s10 + $0x98] sm:$0xff]   ;;  %v3126_v40 = vld [vmem:[%s4117_s10 + $0x10] sm:$0xff]   ;;  %v3115_v45 = vld [vmem:[%s4117_s10 + $0xa0] sm:$0xff]  }
 0x311   : > { %v1725_v48 = vpack.c.bf16 %v1717_v46, %v1716_v47  ;;  %v3023_v57 = vpop.permute.xlu1 %3022  ;;  %2276 = vmatpush1.bf16.msra.mxu1 %v3113_v27  ;;  %v3127_v43 = vld [vmem:[%s4117_s10 + $0x58] sm:$0xff]   ;;  %2667 = vmatpush3.bf16.msra.mxu0 %v3126_v40  ;;  %v3130_v46 = vld [vmem:[%s4117_s10 + $0x20] sm:$0xff]   ;;  %v3132_v47 = vld [vmem:[%s4117_s10 + $0x68] sm:$0xff]  }
 0x312   : > { %v3025_v12 = vunpack.i.h.bf16 %v3023_v57  ;;  %v3024_v38 = vunpack.i.l.bf16 %v3023_v57  ;;  %2277 = vmatprep.subr.bf16.mxu1 %v3215_v32  ;;  %2668 = vmatprep.subr.bf16.mxu0 %v3127_v43  ;;  %v3131_v57 = vld [vmem:[%s4117_s10 + $0xd0] sm:$0xff]   ;;  %v2553_v58 = vld [vmem:[%s4114_s7] ss:$0 sm:$0xff] }
 0x313   : > { %2825 = vmatmul.mubr.msk.bf16.gmra.mrb[52].mxu0 %vm1783_vm8, %v1725_v48  ;;  %v3118_v48 = vld [vmem:[%s4117_s10 + $0xb8] sm:$0xff]  }
 0x314   : > { %v1696_v13 = vsel %vm1684_vm6, %v1683_v17, %v3025_v12  ;;  %v1695_v25 = vsel %vm1684_vm6, %v1682_v29, %v3024_v38 }
 0x315   : > { %v3038_v31 = vpop.permute.xlu0 %3037  ;;  %v3033_v49 = vpop.permute.xlu1 %3032  ;;  %2278 = vmatpush1.bf16.msra.mxu1 %v3114_v33  ;;  %2669 = vmatpush3.bf16.msra.mxu0 %v3128_v56 }
 0x316   : > { %v3040_v6 = vunpack.i.h.bf16 %v3038_v31  ;;  %v3039_v7 = vunpack.i.l.bf16 %v3038_v31  ;;  %v3035_v14 = vunpack.i.h.bf16 %v3033_v49  ;;  %v3034_v37 = vunpack.i.l.bf16 %v3033_v49  ;;  %2279 = vmatprep.subr.bf16.mxu1 %v3215_v32  ;;  %2670 = vmatprep.subr.bf16.mxu0 %v3129_v52 }
 0x318   : > { %v1719_v54 = vsel %vm1709_vm7, %v1706_v8, %v3040_v6  ;;  %v1718_v41 = vsel %vm1709_vm7, %v1705_v10, %v3039_v7  ;;  %v1708_v22 = vsel %vm1251_vm3, %v1696_v13, %v3035_v14  ;;  %v1707_v24 = vsel %vm1251_vm3, %v1695_v25, %v3034_v37  ;;  %v3975_v7 = vld [vmem:[%s4116_s9] ss:$0 sm:$0xff] }
 0x319   : > { %v1726_v9 = vpack.c.bf16 %v1719_v54, %v1718_v41  ;;  %2280 = vmatpush1.bf16.msra.mxu1 %v3115_v45  ;;  %2671 = vmatpush3.bf16.msra.mxu0 %v3130_v46 }
 0x31a   : > { %2281 = vmatprep.subr.bf16.mxu1 %v3215_v32  ;;  %2672 = vmatprep.subr.bf16.mxu0 %v3132_v47 }
 0x31b   : > { %2828 = vmatprep.mubr.msk.bf16.mxu0 %vm1783_vm8, %v1726_v9 }
 0x31d   : > { %v3043_v19 = vpop.permute.xlu1 %3042  ;;  %2282 = vmatpush1.bf16.msra.mxu1 %v3116_v44  ;;  %2673 = vmatpush3.bf16.msra.mxu0 %v3133_v34 }
 0x31e   : > { %v3045_v18 = vunpack.i.h.bf16 %v3043_v19  ;;  %v3044_v20 = vunpack.i.l.bf16 %v3043_v19  ;;  %2283 = vmatprep.subr.bf16.mxu1 %v3215_v32 }
 0x320   : > { %v1721_v3 = vsel %vm1709_vm7, %v1708_v22, %v3045_v18  ;;  %v1720_v23 = vsel %vm1709_vm7, %v1707_v24, %v3044_v20 }
 0x321   : > { %v1727_v61 = vpack.c.bf16 %v1721_v3, %v1720_v23  ;;  %2284 = vmatpush1.bf16.msra.mxu1 %v3117_v50 }
 0x322   : > { %2285 = vmatprep.subr.bf16.mxu1 %v3215_v32 }
 0x323   : > { %2829 = vmatmul.mubr.msk.bf16.gmra.mrb[56].mxu0 %vm1783_vm8, %v1727_v61 }
 0x325   : > { %2286 = vmatpush1.bf16.msra.mxu1 %v3118_v48 }
 0x326   : > { %2287 = vmatprep.subr.bf16.mxu1 %v3215_v32 }
 0x329   : > { %2288 = vmatpush1.bf16.msra.mxu1 %v3119_v16 }
 0x32a   : > { %2289 = vmatprep.subr.bf16.mxu1 %v3215_v32 }
 0x32d   : > { %2290 = vmatpush1.bf16.msra.mxu1 %v3124_v53 }
 0x32e   : > { %2291 = vmatprep.subr.bf16.mxu1 %v3215_v32 }
 0x331   : > { %2292 = vmatpush1.bf16.msra.mxu1 %v3131_v57 }
 0x332   : > { %2293 = vmatprep.subr.bf16.mxu1 %v3215_v32 }
 0x3c6   : > { %v2822_v59 = vpop.f32.mrb[48].mxu0 }
 0x3c7   : > { %v1845_v42 = vadd.f32 %v2822_v59, %v2553_v58  ;;  %v1836_v62 = vpop.f32.mrb[49].mxu0  ;;  %v3134_v59 = vld [vmem:[%s4117_s10 + $0x70] sm:$0xff]  }
 0x3c8   : > { %v1837_v2 = vadd.f32 %v2553_v58, %v1836_v62  ;;  %v2823_v31 = vpop.f32.mrb[50].mxu0  ;;  %2674 = vmatprep.subr.bf16.mxu0 %v3134_v59  ;;  %v3143_v59 = vld [vmem:[%s4119_s12 + $0x20] sm:$0xff]  }
 0x3c9   : > { %v1885_v60 = vmax.f32 %v1845_v42, 0.0  ;;  %v1848_v4 = vadd.f32 %v2823_v31, %v2553_v58  ;;  %v1839_v6 = vpop.f32.mrb[51].mxu0  ;;  %v3135_v42 = vld [vmem:[%s4117_s10 + $0x30] sm:$0xff]  }
 0x3ca   : > { %v1883_v8 = vmax.f32 %v1837_v2, 0.0  ;;  %v1840_v10 = vadd.f32 %v2553_v58, %v1839_v6  ;;  %2675 = vmatpush3.bf16.msra.mxu0 %v3135_v42  ;;  %v3137_v6 = vld [vmem:[%s4117_s10 + $0x78] sm:$0xff]  }
 0x3cb   : > { %v1904_v63 = vmul.f32 %v3970_v0, %v1885_v60  ;;  %v1886_v51 = vmax.f32 %v1848_v4, 0.0  ;;  %2676 = vmatprep.subr.bf16.mxu0 %v3137_v6 }
 0x3cc   : > { %v1902_v54 = vmul.f32 %v3970_v0, %v1883_v8  ;;  %v1884_v41 = vmax.f32 %v1840_v10, 0.0  ;;  %v3138_v8 = vld [vmem:[%s4117_s10 + $0x38] sm:$0xff]  }
 0x3cd   : > { %v1923_v49 = vadd.f32 %v3975_v7, %v1904_v63  ;;  %v1905_v55 = vmul.f32 %v3970_v0, %v1886_v51 }
 0x3ce   : > { %v1921_v5 = vadd.f32 %v3975_v7, %v1902_v54  ;;  %v1903_v9 = vmul.f32 %v3970_v0, %v1884_v41  ;;  %2677 = vmatpush3.bf16.msra.mxu0 %v3138_v8 }
 0x3cf   : > { %v1924_v12 = vadd.f32 %v3975_v7, %v1905_v55  ;;  %2832 = vmatprep.subr.bf16.mxu0 %v3208_v26 }
 0x3d0   : > { %v1933_v38 = vmax.f32 %v1921_v5, %v1923_v49  ;;  %v1922_v14 = vadd.f32 %v3975_v7, %v1903_v9 }
 0x3d2   : > { %v1934_v37 = vmax.f32 %v1922_v14, %v1924_v12 }
 0x3e6   : > { %v2826_v15 = vpop.f32.mrb[52].mxu0 }
 0x3e7   : > { %v1861_v11 = vadd.f32 %v2826_v15, %v2553_v58  ;;  %v1852_v17 = vpop.f32.mrb[53].mxu0 }
 0x3e8   : > { %v1853_v29 = vadd.f32 %v2553_v58, %v1852_v17  ;;  %v2827_v19 = vpop.f32.mrb[54].mxu0 }
 0x3e9   : > { %v1889_v13 = vmax.f32 %v1861_v11, 0.0  ;;  %v1864_v25 = vadd.f32 %v2827_v19, %v2553_v58  ;;  %v1855_v18 = vpop.f32.mrb[55].mxu0 }
 0x3ea   : > { %v1887_v20 = vmax.f32 %v1853_v29, 0.0  ;;  %v1856_v22 = vadd.f32 %v2553_v58, %v1855_v18 }
 0x3eb   : > { %v1890_v24 = vmax.f32 %v1864_v25, 0.0  ;;  %v1908_v3 = vmul.f32 %v3970_v0, %v1889_v13 }
 0x3ec   : > { %v1906_v23 = vmul.f32 %v3970_v0, %v1887_v20  ;;  %v1888_v61 = vmax.f32 %v1856_v22, 0.0 }
 0x3ed   : > { %v1909_v32 = vmul.f32 %v3970_v0, %v1890_v24  ;;  %v1927_v21 = vadd.f32 %v3975_v7, %v1908_v3 }
 0x3ee   : > { %v1925_v28 = vadd.f32 %v3975_v7, %v1906_v23  ;;  %v1907_v35 = vmul.f32 %v3970_v0, %v1888_v61 }
 0x3ef   : > { %v1928_v27 = vadd.f32 %v3975_v7, %v1909_v32 }
 0x3f0   : > { %v1935_v36 = vmax.f32 %v1933_v38, %v1925_v28  ;;  %v1926_v1 = vadd.f32 %v3975_v7, %v1907_v35 }
 0x3f2   : > { %v1936_v39 = vmax.f32 %v1934_v37, %v1926_v1  ;;  %v1937_v30 = vmax.f32 %v1935_v36, %v1927_v21 }
 0x3f4   : > { %v1938_v33 = vmax.f32 %v1936_v39, %v1928_v27 }
 0x3f6   : > { %v2830_v40 = vpop.f32.mrb[56].mxu0 }
 0x3f7   : > { %v1877_v43 = vadd.f32 %v2830_v40, %v2553_v58  ;;  %v1868_v45 = vpop.f32.mrb[57].mxu0 }
 0x3f8   : > { %v1869_v56 = vadd.f32 %v2553_v58, %v1868_v45  ;;  %v2831_v52 = vpop.f32.mrb[58].mxu0 }
 0x3f9   : > { %v1893_v44 = vmax.f32 %v1877_v43, 0.0  ;;  %v1880_v46 = vadd.f32 %v2831_v52, %v2553_v58  ;;  %v1871_v47 = vpop.f32.mrb[59].mxu0 }
 0x3fa   : > { %v1891_v50 = vmax.f32 %v1869_v56, 0.0  ;;  %v1872_v34 = vadd.f32 %v2553_v58, %v1871_v47  ;;  %v3139_v47 = vld [vmem:[%s4119_s12] sm:$0xff]  }
 0x3fb   : > { %v1894_v48 = vmax.f32 %v1880_v46, 0.0  ;;  %v1912_v16 = vmul.f32 %v3970_v0, %v1893_v44 }
 0x3fc   : > { %v1910_v53 = vmul.f32 %v3970_v0, %v1891_v50  ;;  %v1892_v57 = vmax.f32 %v1872_v34, 0.0 }
 0x3fd   : > { %v1913_v2 = vmul.f32 %v3970_v0, %v1894_v48  ;;  %v1931_v31 = vadd.f32 %v3975_v7, %v1912_v16  ;;  %v3140_v16 = vld [vmem:[%s4119_s12 + $0x8] sm:$0xff]  }
 0x3fe   : > { %v1929_v62 = vadd.f32 %v3975_v7, %v1910_v53  ;;  %v1911_v58 = vmul.f32 %v3970_v0, %v1892_v57  ;;  %v3136_v0 = vld [vmem:[%s4117_s10 + $0xd8] sm:$0xff]   ;;  %v3141_v53 = vld [vmem:[%s4119_s12 + $0x10] sm:$0xff]  }
 0x3ff   : > { %v1932_v63 = vadd.f32 %v3975_v7, %v1913_v2  ;;  %2294 = vmatpush1.bf16.msra.mxu1 %v3136_v0  ;;  %v3142_v57 = vld [vmem:[%s4119_s12 + $0x18] sm:$0xff]   ;;  %v2059_v2 = vld [vmem:[%s4118_s11] sm:$0x1] }
 0x400   : > { %v1939_v60 = vmax.f32 %v1937_v30, %v1929_v62  ;;  %v1930_v4 = vadd.f32 %v3975_v7, %v1911_v58 }
 0x402   : > { %v1941_v10 = vmax.f32 %v1939_v60, %v1931_v31  ;;  %v1940_v51 = vmax.f32 %v1938_v33, %v1930_v4 }
 0x404   : > { %v1942_v54 = vmax.f32 %v1940_v51, %v1932_v63  ;;  %v1948_v41 = vrot.slane %v1941_v10, 2  ;;  %v1962_v49 = vrot.slane %v1941_v10, 6  ;;  %v1944_v55 = vrot.slane %v1941_v10, 1 }
 0x405   : > { %v1958_v5 = vrot.slane %v1941_v10, 5  ;;  %v1952_v7 = vrot.slane %v1941_v10, 3  ;;  %v1966_v37 = vrot.slane %v1941_v10, 7  ;;  %v1956_v25 = vrot.slane %v1941_v10, 4 }
 0x406   : > { %v3051_v9 = vpack.i.bf16 %v1948_v41, %v1962_v49  ;;  %v1971_v12 = vrot.slane %v1942_v54, 1  ;;  %v1985_v38 = vrot.slane %v1942_v54, 5  ;;  %v1979_v17 = vrot.slane %v1942_v54, 3 }
 0x407   : > { %v3046_v14 = vpack.i.bf16 %v1944_v55, %v1958_v5  ;;  %v3056_v11 = vpack.i.bf16 %v1952_v7, %v1966_v37  ;;  %v1975_v29 = vrot.slane %v1942_v54, 2  ;;  %v1983_v28 = vrot.slane %v1942_v54, 4 }
 0x408   : > { %3052 = vrot.lane.b32.xlu1 %v3051_v9, %s4137_s28  ;;  %v3061_v15 = vpack.i.bf16 %v1985_v38, %v1971_v12 }
 0x409   : > { %3047 = vrot.lane.b32.xlu0 %v3046_v14, %s4136_s26 }
 0x40c   : > { %3062 = vrot.lane.b32.xlu1 %v3061_v15, %s4136_s26  ;;  %s3217_s26 = smov [#allocation2]  }
 0x40d   : > { %3057 = vrot.lane.b32.xlu0 %v3056_v11, %s3216_s18  ;;  %s3148_s0 = sshll.u32 %s3217_s26, 4  ;;  %s3149_s0 = int_to_ptr.vmem [resolvable:$false] %s3148_s0 }
 0x40e   : > { %s3150_s1 = scalar_lea.vmem %s3149_s0, 32  ;;  %p3151_p0 = scmp.lt.s32.totalorder %s4067_s25, %s3149_s0 }
 0x410   : > { %1980 = vrot.lane.b32.xlu1 %v1979_v17, %s3216_s18  ;;  %s3144_s18 = scalar_lea.vmem %s4067_s25, 16 }
 0x411   : > { %1976 = vrot.lane.b32.xlu0 %v1975_v29, %s4137_s28  ;;  %s4065_s28 = scalar_lea.hbm %s4121_s14, %s2603_s2  ;;  %p3145_p11 = scmp.ne.s32.totalorder %s4067_s25, %s3144_s18 }
 0x412   : > { %p3152_p1 = scmp.lt.s32.totalorder %s3150_s1, %s3144_s18 }
 0x413   : > { %p3146_p12 = pnand %p3145_p11, %p3331_p5 }
 0x414   : > { %p3153_p2 = por %p3152_p1, %p3151_p0 }
 0x415   : > { %p3147_p13 = pneg %p3146_p12 }
 0x417   : > { %p3154_p3 = pnand %p3153_p2, %p3147_p13 }
 0x47a   : > { %v3053_v19 = vpop.permute.xlu1 %3052 }
 0x47b   : > { %v3048_v13 = vpop.permute.xlu0 %3047  ;;  %v3055_v22 = vunpack.i.h.bf16 %v3053_v19  ;;  %v3054_v24 = vunpack.i.l.bf16 %v3053_v19 }
 0x47c   : > { %v3050_v18 = vunpack.i.h.bf16 %v3048_v13  ;;  %v3049_v20 = vunpack.i.l.bf16 %v3048_v13 }
 0x47e   : > { %v1989_v3 = vsel %vm1671_vm5, %v1941_v10, %v3050_v18  ;;  %v1992_v23 = vsel %vm1671_vm5, %v1956_v25, %v3049_v20  ;;  %v3063_v61 = vpop.permute.xlu1 %3062 }
 0x47f   : > { %v3065_v32 = vunpack.i.h.bf16 %v3063_v61  ;;  %v3064_v35 = vunpack.i.l.bf16 %v3063_v61  ;;  %v3058_v21 = vpop.permute.xlu0 %3057  ;;  %v1990_v39 = vsel %vm1251_vm3, %v1989_v3, %v3055_v22  ;;  %v1993_v33 = vsel %vm1251_vm3, %v1992_v23, %v3054_v24 }
 0x480   : > { %v3060_v36 = vunpack.i.h.bf16 %v3058_v21  ;;  %v3059_v1 = vunpack.i.l.bf16 %v3058_v21 }
 0x481   : > { %v1998_v27 = vsel %vm1671_vm5, %v1983_v28, %v3065_v32  ;;  %v1995_v30 = vsel %vm1671_vm5, %v1942_v54, %v3064_v35  ;;  %v2323_v54 = vld [vmem:[%s4120_s13] sm:$0x1] }
 0x482   : > { %v2002_v40 = vpack.c.bf16 %v1998_v27, %v1998_v27  ;;  %v1991_v43 = vsel %vm1783_vm8, %v1990_v39, %v3060_v36  ;;  %v1981_v45 = vpop.permute.xlu1 %1980  ;;  %v1994_v56 = vsel %vm1783_vm8, %v1993_v33, %v3059_v1 }
 0x483   : > { %v1999_v52 = vpack.c.bf16 %v1991_v43, %v1991_v43  ;;  %v1977_v44 = vpop.permute.xlu0 %1976  ;;  %v2000_v46 = vpack.c.bf16 %v1994_v56, %v1994_v56 }
 0x484   : > { %v1996_v50 = vsel %vm1251_vm3, %v1995_v30, %v1977_v44  ;;  %2596 = vmatprep.mubr.msk.bf16.mxu1 %vm1251_vm3, %v2002_v40 }
 0x485   : > { %v1997_v34 = vsel %vm1783_vm8, %v1996_v50, %v1981_v45  ;;  %2263 = vmatprep.mubr.bf16.mxu0 %v2000_v46 }
 0x486   : > { %v2001_v48 = vpack.c.bf16 %v1997_v34, %v1997_v34  ;;  %2264 = vmatmul.mubr.bf16.vlgmr.msra.gmra.mrb[60].mxu0 %v1999_v52 }
 0x487   : > { %2833 = vmatpush3.bf16.msra.mxu0 %v3139_v47  ;;  %2842 = vmatprep.mubr.msk.bf16.mxu0 %vm3209_vm2, %v3208_v26 }
 0x488   : > { %2304 = vmatmul.mubr.bf16.vlgmr.msra.gmra.mrb[60].mxu1 %v2001_v48  ;;  %2834 = vmatprep.subr.bf16.mxu0 %v3208_v26 }
 0x48b   : > { %2835 = vmatpush3.bf16.msra.mxu0 %v3140_v16 }
 0x48c   : > { %2836 = vmatprep.subr.bf16.mxu0 %v3208_v26 }
 0x48f   : > { %2837 = vmatpush3.bf16.msra.mxu0 %v3141_v53 }
 0x490   : > { %2838 = vmatprep.subr.bf16.mxu0 %v3208_v26 }
 0x493   : > { %2839 = vmatpush3.bf16.msra.mxu0 %v3142_v57 }
 0x494   : > { %2840 = vmatprep.subr.bf16.mxu0 %v3208_v26 }
 0x497   : > { %2841 = vmatpush3.bf16.msra.mxu0 %v3143_v59 }
 0x559   : > { %v2678_v42 = vpop.f32.mrb[60].mxu0 }
 0x55a   : > { %v2679_v62 = vpop.f32.mrb[61].mxu0 }
 0x55b   : > { %v2680_v58 = vadd.f32 %v2679_v62, %v2678_v42  ;;  %v2681_v31 = vpop.f32.mrb[62].mxu0  ;;  %v2305_v60 = vpop.f32.mrb[60].mxu1 }
 0x55c   : > { %v2682_v4 = vpop.f32.mrb[63].mxu0  ;;  %v2307_v6 = vpop.f32.mrb[61].mxu1 }
 0x55d   : > { %v2266_v8 = vadd.f32 %v2680_v58, %v2059_v2  ;;  %v2308_v26 = vpop.f32.mrb[62].mxu1 }
 0x55e   : > { %v2309_v10 = vpop.f32.mrb[63].mxu1 }
 0x55f   : > { %v2306_v63 = vadd.f32 %v2305_v60, %v2266_v8 }
 0x561   : > { %v2311_v51 = vmax.f32 %v2306_v63, 0.0 }
 0x563   : > { %v2312_v0 = vpack.c.bf16 %v2311_v51, %v2311_v51 }
 0x565   : > { %2843 = vmatmul.mubr.msk.bf16.vlgmr.msra.gmra.mrb[64].mxu0 %vm1709_vm7, %v2312_v0 }
 0x638   : > { %v2391_v41 = vpop.f32.mrb[64].mxu0 }
 0x639   : > { %v2392_v49 = vadd.f32 %v2391_v41, %v2323_v54  ;;  %v2844_v55 = vpop.f32.mrb[65].mxu0 }
 0x63a   : > { %v2394_v5 = vpop.f32.mrb[66].mxu0 }
 0x63b   : > { %v2845_v9 = vpop.f32.mrb[67].mxu0  ;;  %2398 = vst.msk [vmem:[%s459_s3] sm:$0x1] %vm2397_vm9, %v2392_v49 }
 0x63c   : > { %3157 = shalt.err (!%p3154_p3)
}
 0x63d   : > { %s3158_s21 = scalar_lea.hbm %s4065_s28, 16  ;;  %s3162_s20 = scalar_lea.hbm %s4121_s14, 32 }
 0x63e   : > { %p3159_p4 = scmp.ne.s32.totalorder %s4065_s28, %s3158_s21  ;;  %p3163_p9 = scmp.lt.u32.totalorder %s4065_s28, %s4121_s14 }
 0x63f   : > { %p3164_p10 = scmp.lt.u32.totalorder %s3162_s20, %s3158_s21  ;;  %p3166_p12 = scmp.lt.u32.totalorder %s3158_s21, %s4065_s28 }
 0x640   : > { %p3160_p7 = pnand %p3159_p4, %p3331_p5 }
 0x641   : > { %p3165_p11 = por %p3164_p10, %p3163_p9 }
 0x642   : > { %p3161_p8 = pneg %p3160_p7 }
 0x643   : > { %p3167_p13 = por %p3166_p12, %p3165_p11 }
 0x645   : > { %p3168_p0 = pnand %p3167_p13, %p3161_p8 }
 0x647   : > { %3171 = shalt.err (!%p3168_p0)
}
 0x648   : > { %2848 = dma.vmem_to_hbm [thread:$0]  (%p3331_p5), %s4067_s25, 16, %s4065_s28, %s2400_s17  }
 0x649 PF: > { %p2854_p1 = scmp.ge.s32.totalorder %s3206_s16, 2  ;;  %s2424_s18 = sand.u32 1, %s3194_s29  }
 0x64a   : > { %s2425_s0 = scalar_lea.sflag [#allocation3], %s2424_s18 }
 0x64b   : > { %p2851_p2 = pnand %p2854_p1, %p3335_p6 }
 0x64d   : > { %3189 = dma.done.wait (!%p2851_p2), %s2425_s0, 16  }
 0x64e   : > { %3191 = vsyncadd (!%p2851_p2), %s2425_s0, 4294967280  ;;  %p24_p3 = scmp.ge.s32.totalorder %s3318_s19, 4   ;;  %s4138_s29 = smov %s3198_s30 }
 0x64f   : > { %s4139_s30 = smov %s3202_s15  ;;  %s4140_s15 = smov %s3329_s22 }
 0x650   : > { %s4141_s16 = smov %s3318_s19  ;;  %26 = sbr.rel (!%p24_p3) target bundleno = 8 (0x8), region = 111 }
 0x657   :  { %2429 = vsyncpa [#allocation3], 1 }
 0x658   :  { %2431 = vsyncpa [#allocation3 + $0x1], 1 }

</bundles_post_ra>
